<compile_context>
chip_gen: v7x
topology: tpu7x:2x2x1
jax: 0.10.0
libtpu: 0.0.40
codegen_flags: <defaults>
</compile_context>

<pallas_src>
import functools

import jax
import jax.numpy as jnp
from jax.experimental import pallas as pl
from jax.experimental.pallas import tpu as pltpu

EPS = 1e-5       # PyTorch BatchNorm2d default
C1P = 128        # layer-1 out-channels padded 64 -> 128 (lane-dense)
K1 = 128         # layer-1 contraction padded 3 -> 128 (standard MXU dot)
CATP = 128       # FC output padded category -> 128 (lane-dense store)


def _conv_out_len(h):
    # series axis: kernel 3, stride 2, padding 1
    return (h + 2 * 1 - 3) // 2 + 1


# ----------------------------------------------------------------------------
# The single fused Pallas kernel: 4x (conv + BN + ReLU) -> mean pool -> FC
# Row ordering of every activation slab: (series, modal, batch).
# ----------------------------------------------------------------------------
def _cnn_fused_kernel(x1_ref,                           # [R1, K1] lane-packed input
                      w1_ref, st1_ref,                  # layer 1 (Cin=1)
                      w2_ref, st2_ref,                  # layer 2 (K-stacked)
                      w3_ref, st3_ref,                  # layer 3 (K-stacked)
                      w4_ref, st4_ref,                  # layer 4 (K-stacked)
                      wfc_ref, bfc_ref,                 # FC (pre-permuted, flat K)
                      o_ref,
                      *, B, M, Ho1):
    f32 = jnp.float32
    bf16 = jnp.bfloat16
    BM = B * M

    def epilogue(acc, st_ref):
        scale = st_ref[0:1, :]                          # hoisted: read once/layer
        off = st_ref[1:2, :]
        return jnp.maximum(acc * scale + off, 0.0)      # f32

    # ---- layer 1: one padded-K MXU dot (bf16 operands, f32 accumulate).
    acc1 = jnp.dot(x1_ref[...], w1_ref[...], preferred_element_type=f32)
    y = epilogue(acc1, st1_ref)                         # [Ho1*BM, C1P] f32
    act = y.astype(bf16)
    H = Ho1

    # ---- layers 2..4: one K-stacked MXU dot per layer + fused BN/ReLU.
    for w_ref, st_ref in ((w2_ref, st2_ref), (w3_ref, st3_ref), (w4_ref, st4_ref)):
        Ho = _conv_out_len(H)
        Cin = act.shape[1]
        zero = jnp.zeros((BM, Cin), bf16)
        cols = []
        for kh in range(3):
            parts = []
            for ho in range(Ho):
                hi = 2 * ho + kh - 1
                parts.append(act[hi * BM:(hi + 1) * BM, :] if 0 <= hi < H else zero)
            cols.append(parts[0] if Ho == 1 else jnp.concatenate(parts, axis=0))
        xk = jnp.concatenate(cols, axis=1)              # [Ho*BM, 3*Cin] bf16
        acc = jnp.dot(xk, w_ref[...], preferred_element_type=f32)
        y = epilogue(acc, st_ref)                       # [Ho*BM, Cout] f32
        act = y.astype(bf16)
        H = Ho

    # ---- AdaptiveAvgPool2d((1, modal)) == mean over the remaining series axis.
    pooled = y[0:BM, :]
    for h in range(1, H):
        pooled = pooled + y[h * BM:(h + 1) * BM, :]
    if H > 1:
        pooled = pooled * (1.0 / H)                     # [BM, 512] f32, rows (m, b)

    # ---- FC: lane-concat the per-modal rows -> [B, M*512], one dot, direct store.
    fc_lhs = jnp.concatenate(
        [pooled[m * B:(m + 1) * B, :] for m in range(M)], axis=1).astype(bf16)
    out = jnp.dot(fc_lhs, wfc_ref[...], preferred_element_type=f32) + bfc_ref[...]
    o_ref[...] = out                                    # [B, CATP] f32


# ----------------------------------------------------------------------------
# Wrapper
# ----------------------------------------------------------------------------
def cnn_forward(x_nchw, params):
    """x_nchw: [B, 1, series, modal] -> logits [B, category]."""
    B, cin, H0, M = x_nchw.shape
    assert cin == 1
    Ho1 = _conv_out_len(H0)
    BM = B * M
    assert BM % 8 == 0, "BM should be sublane-aligned (multiples of 16 are ideal)"
    R1 = Ho1 * BM

    # Tiny input prep in XLA: ONE lane-packed slab holding the three series-
    # shifted views of the single-channel input, rows ordered (h_out, m, b).
    xin = x_nchw[:, 0]                                   # [B, H0, M]
    xpad = jnp.pad(xin, ((0, 0), (1, 1), (0, 0)))        # [B, H0+2, M]
    cols = []
    for kh in range(3):
        s = xpad[:, kh: kh + 2 * Ho1 - 1: 2, :]          # [B, Ho1, M]
        cols.append(jnp.transpose(s, (1, 2, 0)).reshape(R1, 1))
    slab = jnp.concatenate(cols, axis=1)                 # [R1, 3]
    slab = jnp.pad(slab, ((0, 0), (0, K1 - 3))).astype(jnp.bfloat16)  # [R1, K1]

    p = params
    args = (slab,
            p["w1"], p["st1"], p["w2"], p["st2"],
            p["w3"], p["st3"], p["w4"], p["st4"],
            p["wfc"], p["bfc"])

    # Advisory cost hint for the XLA scheduler.
    macs = R1 * K1 * C1P
    h = Ho1
    for ci_p, co in ((C1P, 128), (128, 256), (256, 512)):
        ho = _conv_out_len(h)
        macs += (ho * BM) * (3 * ci_p) * co
        h = ho
    macs += B * (M * 512) * CATP
    bytes_accessed = sum(int(a.size) * a.dtype.itemsize for a in args) + B * CATP * 4

    kernel = functools.partial(_cnn_fused_kernel, B=B, M=M, Ho1=Ho1)
    out = pl.pallas_call(
        kernel,
        out_shape=jax.ShapeDtypeStruct((B, CATP), jnp.float32),
        cost_estimate=pl.CostEstimate(flops=int(2 * macs), transcendentals=0,
                                      bytes_accessed=int(bytes_accessed)),
        compiler_params=pltpu.CompilerParams(vmem_limit_bytes=32 * 1024 * 1024),
    )(*args)
    return out[:, :p["category"]]


# ----------------------------------------------------------------------------
# Parameters (random, deterministic) in both raw and kernel-folded layouts
# ----------------------------------------------------------------------------
def init_params(key, modal, category):
    # TODO(synk): BatchNorm2d is folded in eval mode (running stats); train-mode
    # batch statistics are not implemented (inference-only kernel).
    channels = [1, 64, 128, 256, 512]
    raw_convs, folded = [], []
    for i in range(4):
        ci, co = channels[i], channels[i + 1]
        key, k1, k2, k3, k4, k5, k6 = jax.random.split(key, 7)
        w = jax.random.normal(k1, (3, ci, co), jnp.float32) / jnp.sqrt(3.0 * ci)
        b = 0.01 * jax.random.normal(k2, (co,), jnp.float32)
        gamma = 1.0 + 0.1 * jax.random.normal(k3, (co,), jnp.float32)
        beta = 0.1 * jax.random.normal(k4, (co,), jnp.float32)
        mean = 0.1 * jax.random.normal(k5, (co,), jnp.float32)
        var = jnp.abs(1.0 + 0.1 * jax.random.normal(k6, (co,), jnp.float32))
        raw_convs.append((w, b, gamma, beta, mean, var))
        scale = gamma / jnp.sqrt(var + EPS)
        offset = scale * (b - mean) + beta      # fold conv bias + BN
        folded.append((w, scale, offset))

    key, kw, kb = jax.random.split(key, 3)
    fc_in = 512 * modal
    fc_w = jax.random.normal(kw, (fc_in, category), jnp.float32) / jnp.sqrt(float(fc_in))
    fc_b = 0.01 * jax.random.normal(kb, (category,), jnp.float32)

    def st(scale, offset, cpad):
        s = jnp.zeros((2, cpad), jnp.float32)
        s = s.at[0, :scale.shape[0]].set(scale)
        s = s.at[1, :offset.shape[0]].set(offset)
        return s

    (w1, s1, t1), (w2, s2, t2), (w3, s3, t3), (w4, s4, t4) = folded

    # layer 1: [K1, C1P] -- 3 taps in rows 0..2, out-channels padded 64 -> 128.
    w1k = jnp.zeros((K1, C1P), jnp.float32).at[:3, :64].set(w1[:, 0, :])
    # layers 2..4: K-stacked [3*CinP, Cout] (layer-2 Cin padded 64 -> 128).
    w2k = jnp.zeros((3 * C1P, 128), jnp.float32)
    for kh in range(3):
        w2k = w2k.at[kh * C1P: kh * C1P + 64, :].set(w2[kh])
    w3k = w3.reshape(3 * 128, 256)
    w4k = w4.reshape(3 * 256, 512)
    # FC: PyTorch flatten order is (channel, modal); permute once to the kernel's
    # (modal, channel) lane-concat order -> [modal*512, CATP].
    wfc_perm = fc_w.reshape(512, modal, category).transpose(1, 0, 2)
    wfc_perm = wfc_perm.reshape(modal * 512, category)
    wfck = jnp.zeros((modal * 512, CATP), jnp.float32).at[:, :category].set(wfc_perm)
    bfck = jnp.zeros((1, CATP), jnp.float32).at[0, :category].set(fc_b)

    bf = jnp.bfloat16
    return {
        "category": category,
        "raw_convs": raw_convs, "fc_w": fc_w, "fc_b": fc_b,   # for the reference
        "w1": w1k.astype(bf), "st1": st(s1, t1, C1P),
        "w2": w2k.astype(bf), "st2": st(s2, t2, 128),
        "w3": w3k.astype(bf), "st3": st(s3, t3, 256),
        "w4": w4k.astype(bf), "st4": st(s4, t4, 512),
        "wfc": wfck.astype(bf), "bfc": bfck,
    }


# ----------------------------------------------------------------------------
# Pure-JAX reference (lax.conv, f32/HIGHEST) for validation
# ----------------------------------------------------------------------------
def reference_forward(x_nchw, params):
    x = jnp.transpose(x_nchw, (0, 2, 3, 1))              # NHWC
    for (w, b, gamma, beta, mean, var) in params["raw_convs"]:
        kh, ci, co = w.shape
        rhs = w.reshape(kh, 1, ci, co)                   # HWIO
        y = jax.lax.conv_general_dilated(
            x, rhs, window_strides=(2, 1), padding=((1, 1), (0, 0)),
            dimension_numbers=("NHWC", "HWIO", "NHWC"),
            precision=jax.lax.Precision.HIGHEST) + b
        y = (y - mean) / jnp.sqrt(var + EPS) * gamma + beta
        x = jnp.maximum(y, 0.0)
    pooled = jnp.mean(x, axis=1)                         # [B, M, C]
    flat = jnp.transpose(pooled, (0, 2, 1)).reshape(x.shape[0], -1)  # (c, m) order
    return jnp.dot(flat, params["fc_w"],
                   precision=jax.lax.Precision.HIGHEST) + params["fc_b"]


if __name__ == "__main__":
    B, C, SERIES, MODAL = 2, 1, 16, 8
    CATEGORY = 6

    key = jax.random.PRNGKey(0)
    key, kx = jax.random.split(key)
    x = jax.random.normal(kx, (B, C, SERIES, MODAL), jnp.float32)
    params = init_params(key, MODAL, CATEGORY)

    fwd = jax.jit(lambda xx: cnn_forward(xx, params))
    out = jax.block_until_ready(fwd(x))
    assert out.shape == (B, CATEGORY), out.shape

    ref = reference_forward(x, params)
    # bf16 MXU operands vs f32/HIGHEST reference -> slightly relaxed tolerance.
    if not jnp.allclose(out, ref, rtol=2e-2, atol=2e-2):
        raise AssertionError(
            f"mismatch vs reference: max abs diff = {float(jnp.max(jnp.abs(out - ref)))}")
    print("KERNEL_OK")
</pallas_src>

<mosaic_0001>
module attributes {stable_mosaic.version = 11 : i64} {
  func.func @_cnn_fused_kernel(%arg0: memref<128x128xbf16, #tpu.memory_space<vmem>>, %arg1: memref<128x128xbf16, #tpu.memory_space<vmem>>, %arg2: memref<2x128xf32, #tpu.memory_space<vmem>>, %arg3: memref<384x128xbf16, #tpu.memory_space<vmem>>, %arg4: memref<2x128xf32, #tpu.memory_space<vmem>>, %arg5: memref<384x256xbf16, #tpu.memory_space<vmem>>, %arg6: memref<2x256xf32, #tpu.memory_space<vmem>>, %arg7: memref<768x512xbf16, #tpu.memory_space<vmem>>, %arg8: memref<2x512xf32, #tpu.memory_space<vmem>>, %arg9: memref<4096x128xbf16, #tpu.memory_space<vmem>>, %arg10: memref<1x128xf32, #tpu.memory_space<vmem>>, %arg11: memref<2x128xf32, #tpu.memory_space<vmem>>) attributes {dimension_semantics = [], scalar_prefetch = 0 : i64, scratch_operands = 0 : i64, tpu.core_type = #tpu.core_type<tc>} {
    %c0 = arith.constant 0 : index
    %c0_0 = arith.constant 0 : index
    %0 = vector.load %arg0[%c0, %c0_0] : memref<128x128xbf16, #tpu.memory_space<vmem>>, vector<128x128xbf16>
    %c0_1 = arith.constant 0 : index
    %c0_2 = arith.constant 0 : index
    %1 = vector.load %arg1[%c0_1, %c0_2] : memref<128x128xbf16, #tpu.memory_space<vmem>>, vector<128x128xbf16>
    %cst = arith.constant dense<0.000000e+00> : vector<128x128xf32>
    %2 = tpu.matmul %0, %1, %cst {dimension_numbers = #tpu.dot_dimension_numbers<[1], [0], [0], [1], [0, 0, 1, 1], [], []>} : vector<128x128xbf16>, vector<128x128xbf16>, vector<128x128xf32> -> vector<128x128xf32>
    %c0_3 = arith.constant 0 : index
    %c0_4 = arith.constant 0 : index
    %3 = vector.load %arg2[%c0_3, %c0_4] : memref<2x128xf32, #tpu.memory_space<vmem>>, vector<1x128xf32>
    %c1 = arith.constant 1 : index
    %c0_5 = arith.constant 0 : index
    %4 = vector.load %arg2[%c1, %c0_5] : memref<2x128xf32, #tpu.memory_space<vmem>>, vector<1x128xf32>
    %5 = vector.broadcast %3 : vector<1x128xf32> to vector<128x128xf32>
    %6 = arith.mulf %2, %5 : vector<128x128xf32>
    %7 = vector.broadcast %4 : vector<1x128xf32> to vector<128x128xf32>
    %8 = arith.addf %6, %7 : vector<128x128xf32>
    %cst_6 = arith.constant 0.000000e+00 : f32
    %9 = vector.broadcast %cst_6 : f32 to vector<128x128xf32>
    %10 = arith.maximumf %8, %9 : vector<128x128xf32>
    %11 = arith.truncf %10 : vector<128x128xf32> to vector<128x128xbf16>
    %cst_7 = arith.constant 0.000000e+00 : bf16
    %12 = vector.broadcast %cst_7 : bf16 to vector<16x128xbf16>
    %13 = vector.extract_strided_slice %11 {offsets = [16, 0], sizes = [16, 128], strides = [1, 1]} : vector<128x128xbf16> to vector<16x128xbf16>
    %14 = vector.extract_strided_slice %11 {offsets = [48, 0], sizes = [16, 128], strides = [1, 1]} : vector<128x128xbf16> to vector<16x128xbf16>
    %15 = vector.extract_strided_slice %11 {offsets = [80, 0], sizes = [16, 128], strides = [1, 1]} : vector<128x128xbf16> to vector<16x128xbf16>
    %16 = tpu.concatenate %12, %13, %14, %15 in 0 : vector<16x128xbf16>, vector<16x128xbf16>, vector<16x128xbf16>, vector<16x128xbf16> -> vector<64x128xbf16>
    %17 = vector.extract_strided_slice %11 {offsets = [0, 0], sizes = [16, 128], strides = [1, 1]} : vector<128x128xbf16> to vector<16x128xbf16>
    %18 = vector.extract_strided_slice %11 {offsets = [32, 0], sizes = [16, 128], strides = [1, 1]} : vector<128x128xbf16> to vector<16x128xbf16>
    %19 = vector.extract_strided_slice %11 {offsets = [64, 0], sizes = [16, 128], strides = [1, 1]} : vector<128x128xbf16> to vector<16x128xbf16>
    %20 = vector.extract_strided_slice %11 {offsets = [96, 0], sizes = [16, 128], strides = [1, 1]} : vector<128x128xbf16> to vector<16x128xbf16>
    %21 = tpu.concatenate %17, %18, %19, %20 in 0 : vector<16x128xbf16>, vector<16x128xbf16>, vector<16x128xbf16>, vector<16x128xbf16> -> vector<64x128xbf16>
    %22 = vector.extract_strided_slice %11 {offsets = [16, 0], sizes = [16, 128], strides = [1, 1]} : vector<128x128xbf16> to vector<16x128xbf16>
    %23 = vector.extract_strided_slice %11 {offsets = [48, 0], sizes = [16, 128], strides = [1, 1]} : vector<128x128xbf16> to vector<16x128xbf16>
    %24 = vector.extract_strided_slice %11 {offsets = [80, 0], sizes = [16, 128], strides = [1, 1]} : vector<128x128xbf16> to vector<16x128xbf16>
    %25 = vector.extract_strided_slice %11 {offsets = [112, 0], sizes = [16, 128], strides = [1, 1]} : vector<128x128xbf16> to vector<16x128xbf16>
    %26 = tpu.concatenate %22, %23, %24, %25 in 0 : vector<16x128xbf16>, vector<16x128xbf16>, vector<16x128xbf16>, vector<16x128xbf16> -> vector<64x128xbf16>
    %27 = tpu.concatenate %16, %21, %26 in 1 : vector<64x128xbf16>, vector<64x128xbf16>, vector<64x128xbf16> -> vector<64x384xbf16>
    %c0_8 = arith.constant 0 : index
    %c0_9 = arith.constant 0 : index
    %28 = vector.load %arg3[%c0_8, %c0_9] : memref<384x128xbf16, #tpu.memory_space<vmem>>, vector<384x128xbf16>
    %cst_10 = arith.constant dense<0.000000e+00> : vector<64x128xf32>
    %29 = tpu.matmul %27, %28, %cst_10 {dimension_numbers = #tpu.dot_dimension_numbers<[1], [0], [0], [1], [0, 0, 1, 1], [], []>} : vector<64x384xbf16>, vector<384x128xbf16>, vector<64x128xf32> -> vector<64x128xf32>
    %c0_11 = arith.constant 0 : index
    %c0_12 = arith.constant 0 : index
    %30 = vector.load %arg4[%c0_11, %c0_12] : memref<2x128xf32, #tpu.memory_space<vmem>>, vector<1x128xf32>
    %c1_13 = arith.constant 1 : index
    %c0_14 = arith.constant 0 : index
    %31 = vector.load %arg4[%c1_13, %c0_14] : memref<2x128xf32, #tpu.memory_space<vmem>>, vector<1x128xf32>
    %32 = vector.broadcast %30 : vector<1x128xf32> to vector<64x128xf32>
    %33 = arith.mulf %29, %32 : vector<64x128xf32>
    %34 = vector.broadcast %31 : vector<1x128xf32> to vector<64x128xf32>
    %35 = arith.addf %33, %34 : vector<64x128xf32>
    %cst_15 = arith.constant 0.000000e+00 : f32
    %36 = vector.broadcast %cst_15 : f32 to vector<64x128xf32>
    %37 = arith.maximumf %35, %36 : vector<64x128xf32>
    %38 = arith.truncf %37 : vector<64x128xf32> to vector<64x128xbf16>
    %cst_16 = arith.constant 0.000000e+00 : bf16
    %39 = vector.broadcast %cst_16 : bf16 to vector<16x128xbf16>
    %40 = vector.extract_strided_slice %38 {offsets = [16, 0], sizes = [16, 128], strides = [1, 1]} : vector<64x128xbf16> to vector<16x128xbf16>
    %41 = tpu.concatenate %39, %40 in 0 : vector<16x128xbf16>, vector<16x128xbf16> -> vector<32x128xbf16>
    %42 = vector.extract_strided_slice %38 {offsets = [0, 0], sizes = [16, 128], strides = [1, 1]} : vector<64x128xbf16> to vector<16x128xbf16>
    %43 = vector.extract_strided_slice %38 {offsets = [32, 0], sizes = [16, 128], strides = [1, 1]} : vector<64x128xbf16> to vector<16x128xbf16>
    %44 = tpu.concatenate %42, %43 in 0 : vector<16x128xbf16>, vector<16x128xbf16> -> vector<32x128xbf16>
    %45 = vector.extract_strided_slice %38 {offsets = [16, 0], sizes = [16, 128], strides = [1, 1]} : vector<64x128xbf16> to vector<16x128xbf16>
    %46 = vector.extract_strided_slice %38 {offsets = [48, 0], sizes = [16, 128], strides = [1, 1]} : vector<64x128xbf16> to vector<16x128xbf16>
    %47 = tpu.concatenate %45, %46 in 0 : vector<16x128xbf16>, vector<16x128xbf16> -> vector<32x128xbf16>
    %48 = tpu.concatenate %41, %44, %47 in 1 : vector<32x128xbf16>, vector<32x128xbf16>, vector<32x128xbf16> -> vector<32x384xbf16>
    %c0_17 = arith.constant 0 : index
    %c0_18 = arith.constant 0 : index
    %49 = vector.load %arg5[%c0_17, %c0_18] : memref<384x256xbf16, #tpu.memory_space<vmem>>, vector<384x256xbf16>
    %cst_19 = arith.constant dense<0.000000e+00> : vector<32x256xf32>
    %50 = tpu.matmul %48, %49, %cst_19 {dimension_numbers = #tpu.dot_dimension_numbers<[1], [0], [0], [1], [0, 0, 1, 1], [], []>} : vector<32x384xbf16>, vector<384x256xbf16>, vector<32x256xf32> -> vector<32x256xf32>
    %c0_20 = arith.constant 0 : index
    %c0_21 = arith.constant 0 : index
    %51 = vector.load %arg6[%c0_20, %c0_21] : memref<2x256xf32, #tpu.memory_space<vmem>>, vector<1x256xf32>
    %c1_22 = arith.constant 1 : index
    %c0_23 = arith.constant 0 : index
    %52 = vector.load %arg6[%c1_22, %c0_23] : memref<2x256xf32, #tpu.memory_space<vmem>>, vector<1x256xf32>
    %53 = vector.broadcast %51 : vector<1x256xf32> to vector<32x256xf32>
    %54 = arith.mulf %50, %53 : vector<32x256xf32>
    %55 = vector.broadcast %52 : vector<1x256xf32> to vector<32x256xf32>
    %56 = arith.addf %54, %55 : vector<32x256xf32>
    %cst_24 = arith.constant 0.000000e+00 : f32
    %57 = vector.broadcast %cst_24 : f32 to vector<32x256xf32>
    %58 = arith.maximumf %56, %57 : vector<32x256xf32>
    %59 = arith.truncf %58 : vector<32x256xf32> to vector<32x256xbf16>
    %cst_25 = arith.constant 0.000000e+00 : bf16
    %60 = vector.broadcast %cst_25 : bf16 to vector<16x256xbf16>
    %61 = vector.extract_strided_slice %59 {offsets = [0, 0], sizes = [16, 256], strides = [1, 1]} : vector<32x256xbf16> to vector<16x256xbf16>
    %62 = vector.extract_strided_slice %59 {offsets = [16, 0], sizes = [16, 256], strides = [1, 1]} : vector<32x256xbf16> to vector<16x256xbf16>
    %63 = tpu.concatenate %60, %61, %62 in 1 : vector<16x256xbf16>, vector<16x256xbf16>, vector<16x256xbf16> -> vector<16x768xbf16>
    %c0_26 = arith.constant 0 : index
    %c0_27 = arith.constant 0 : index
    %64 = vector.load %arg7[%c0_26, %c0_27] : memref<768x512xbf16, #tpu.memory_space<vmem>>, vector<768x512xbf16>
    %cst_28 = arith.constant dense<0.000000e+00> : vector<16x512xf32>
    %65 = tpu.matmul %63, %64, %cst_28 {dimension_numbers = #tpu.dot_dimension_numbers<[1], [0], [0], [1], [0, 0, 1, 1], [], []>} : vector<16x768xbf16>, vector<768x512xbf16>, vector<16x512xf32> -> vector<16x512xf32>
    %c0_29 = arith.constant 0 : index
    %c0_30 = arith.constant 0 : index
    %66 = vector.load %arg8[%c0_29, %c0_30] : memref<2x512xf32, #tpu.memory_space<vmem>>, vector<1x512xf32>
    %c1_31 = arith.constant 1 : index
    %c0_32 = arith.constant 0 : index
    %67 = vector.load %arg8[%c1_31, %c0_32] : memref<2x512xf32, #tpu.memory_space<vmem>>, vector<1x512xf32>
    %68 = vector.broadcast %66 : vector<1x512xf32> to vector<16x512xf32>
    %69 = arith.mulf %65, %68 : vector<16x512xf32>
    %70 = vector.broadcast %67 : vector<1x512xf32> to vector<16x512xf32>
    %71 = arith.addf %69, %70 : vector<16x512xf32>
    %cst_33 = arith.constant 0.000000e+00 : f32
    %72 = vector.broadcast %cst_33 : f32 to vector<16x512xf32>
    %73 = arith.maximumf %71, %72 : vector<16x512xf32>
    %74 = vector.extract_strided_slice %73 {offsets = [0, 0], sizes = [2, 512], strides = [1, 1]} : vector<16x512xf32> to vector<2x512xf32>
    %75 = vector.extract_strided_slice %73 {offsets = [2, 0], sizes = [2, 512], strides = [1, 1]} : vector<16x512xf32> to vector<2x512xf32>
    %76 = vector.extract_strided_slice %73 {offsets = [4, 0], sizes = [2, 512], strides = [1, 1]} : vector<16x512xf32> to vector<2x512xf32>
    %77 = vector.extract_strided_slice %73 {offsets = [6, 0], sizes = [2, 512], strides = [1, 1]} : vector<16x512xf32> to vector<2x512xf32>
    %78 = vector.extract_strided_slice %73 {offsets = [8, 0], sizes = [2, 512], strides = [1, 1]} : vector<16x512xf32> to vector<2x512xf32>
    %79 = vector.extract_strided_slice %73 {offsets = [10, 0], sizes = [2, 512], strides = [1, 1]} : vector<16x512xf32> to vector<2x512xf32>
    %80 = vector.extract_strided_slice %73 {offsets = [12, 0], sizes = [2, 512], strides = [1, 1]} : vector<16x512xf32> to vector<2x512xf32>
    %81 = vector.extract_strided_slice %73 {offsets = [14, 0], sizes = [2, 512], strides = [1, 1]} : vector<16x512xf32> to vector<2x512xf32>
    %82 = tpu.concatenate %74, %75, %76, %77, %78, %79, %80, %81 in 1 : vector<2x512xf32>, vector<2x512xf32>, vector<2x512xf32>, vector<2x512xf32>, vector<2x512xf32>, vector<2x512xf32>, vector<2x512xf32>, vector<2x512xf32> -> vector<2x4096xf32>
    %83 = arith.truncf %82 : vector<2x4096xf32> to vector<2x4096xbf16>
    %c0_34 = arith.constant 0 : index
    %c0_35 = arith.constant 0 : index
    %84 = vector.load %arg9[%c0_34, %c0_35] : memref<4096x128xbf16, #tpu.memory_space<vmem>>, vector<4096x128xbf16>
    %cst_36 = arith.constant dense<0.000000e+00> : vector<2x128xf32>
    %85 = tpu.matmul %83, %84, %cst_36 {dimension_numbers = #tpu.dot_dimension_numbers<[1], [0], [0], [1], [0, 0, 1, 1], [], []>} : vector<2x4096xbf16>, vector<4096x128xbf16>, vector<2x128xf32> -> vector<2x128xf32>
    %c0_37 = arith.constant 0 : index
    %c0_38 = arith.constant 0 : index
    %86 = vector.load %arg10[%c0_37, %c0_38] : memref<1x128xf32, #tpu.memory_space<vmem>>, vector<1x128xf32>
    %87 = vector.broadcast %86 : vector<1x128xf32> to vector<2x128xf32>
    %88 = arith.addf %85, %87 : vector<2x128xf32>
    %c0_39 = arith.constant 0 : index
    %c0_40 = arith.constant 0 : index
    %89 = vector.load %arg11[%c0_39, %c0_40] : memref<2x128xf32, #tpu.memory_space<vmem>>, vector<2x128xf32>
    tpu.vector_store %arg11[%c0_39, %c0_40], %88 {strides = array<i32>} : memref<2x128xf32, #tpu.memory_space<vmem>>, vector<2x128xf32>,
    return
  }
}

</mosaic_0001>

<bundles_post_ra>
// kernel: _lambda_.1
= control target key start
LH: loop header
LB: loop body
LE: loop exit
PB: predicated region body
PF: predicated region fallthrough
CT: control target
= control target key end

     0   :  { %s9010_s0 = inlined_call_operand.vmem [shape: bf16[128,128], index: 0, kind: input, shape index: {}]   ;;  %s9011_s1 = inlined_call_operand.vmem [shape: bf16[128,128], index: 1, kind: input, shape index: {}]   ;;  %s9012_s2 = inlined_call_operand.vmem [shape: f32[2,128], index: 2, kind: input, shape index: {}]   ;;  %s9013_s3 = inlined_call_operand.vmem [shape: bf16[384,128], index: 3, kind: input, shape index: {}]   ;;  %s9014_s4 = inlined_call_operand.vmem [shape: f32[2,128], index: 4, kind: input, shape index: {}]   ;;  %s9015_s5 = inlined_call_operand.vmem [shape: bf16[384,256], index: 5, kind: input, shape index: {}]   ;;  %s9016_s6 = inlined_call_operand.vmem [shape: f32[2,256], index: 6, kind: input, shape index: {}]   ;;  %s9017_s7 = inlined_call_operand.vmem [shape: bf16[768,512], index: 7, kind: input, shape index: {}]   ;;  %s9018_s8 = inlined_call_operand.vmem [shape: f32[2,512], index: 8, kind: input, shape index: {}]   ;;  %s9019_s9 = inlined_call_operand.vmem [shape: bf16[4096,128], index: 9, kind: input, shape index: {}]   ;;  %s9020_s10 = inlined_call_operand.vmem [shape: f32[1,128], index: 10, kind: input, shape index: {}]   ;;  %s9021_s11 = inlined_call_operand.hbm [shape: f32[2,128], index: 11, kind: output, shape index: {}]  }
   0x1   :  { %v6460_v0 = vld [vmem:[%s9011_s1] sm:$0xff]   ;;  %v6461_v1 = vld [vmem:[%s9011_s1 + $0x8] sm:$0xff]   ;;  %v6462_v2 = vld [vmem:[%s9011_s1 + $0x10] sm:$0xff]  }
   0x2   :  { %6378 = vmatprep.subr.bf16.mxu0 %v6460_v0  ;;  %v6463_v3 = vld [vmem:[%s9011_s1 + $0x18] sm:$0xff]   ;;  %v6468_v4 = vld [vmem:[%s9010_s0] sm:$0xff]   ;;  %v6465_v6 = vld [vmem:[%s9011_s1 + $0x28] sm:$0xff]  }
   0x3   :  { %6379 = vmatpush3.bf16.msra.mxu0 %v6460_v0  ;;  %6394 = vmatprep.mubr.bf16.mxu0 %v6468_v4  ;;  %v6464_v5 = vld [vmem:[%s9011_s1 + $0x20] sm:$0xff]   ;;  %v6478_v9 = vld [vmem:[%s9013_s3 + $0x48] sm:$0xff]   ;;  %v6466_v11 = vld [vmem:[%s9011_s1 + $0x30] sm:$0xff]  }
   0x4   :  { %6380 = vmatprep.subr.bf16.mxu0 %v6461_v1  ;;  %v6476_v7 = vld [vmem:[%s9013_s3 + $0x40] sm:$0xff]   ;;  %v6479_v10 = vld [vmem:[%s9013_s3 + $0x8] sm:$0xff]   ;;  %v6481_v12 = vld [vmem:[%s9013_s3 + $0x50] sm:$0xff]  }
   0x5   :  { %v6477_v8 = vld [vmem:[%s9013_s3] sm:$0xff]   ;;  %5974 = vmatprep.subr.bf16.mxu1 %v6476_v7  ;;  %v6467_v13 = vld [vmem:[%s9011_s1 + $0x38] sm:$0xff]   ;;  %v6482_v14 = vld [vmem:[%s9013_s3 + $0x10] sm:$0xff]  }
   0x6   :  { %5975 = vmatpush3.bf16.msra.mxu1 %v6477_v8  ;;  %v6484_v15 = vld [vmem:[%s9013_s3 + $0x58] sm:$0xff]   ;;  %v6480_v16 = vld [vmem:[%s9013_s3 + $0x80] sm:$0xff]   ;;  %v6469_v18 = vld [vmem:[%s9010_s0 + $0x8] sm:$0xff]  }
   0x7   :  { %6381 = vmatpush3.bf16.msra.mxu0 %v6461_v1  ;;  %5976 = vmatprep.subr.bf16.mxu1 %v6478_v9  ;;  %v6485_v17 = vld [vmem:[%s9013_s3 + $0x18] sm:$0xff]   ;;  %v6487_v19 = vld [vmem:[%s9013_s3 + $0x60] sm:$0xff]   ;;  %v6470_v20 = vld [vmem:[%s9010_s0 + $0x10] sm:$0xff]  }
   0x8   :  { %6382 = vmatprep.subr.bf16.mxu0 %v6462_v2  ;;  %v6483_v21 = vld [vmem:[%s9013_s3 + $0x88] sm:$0xff]   ;;  %v6488_v22 = vld [vmem:[%s9013_s3 + $0x20] sm:$0xff]   ;;  %v6486_v23 = vld [vmem:[%s9013_s3 + $0x90] sm:$0xff]  }
   0x9   :  { %v6471_v24 = vld [vmem:[%s9010_s0 + $0x18] sm:$0xff]   ;;  %v6472_v25 = vld [vmem:[%s9010_s0 + $0x20] sm:$0xff]   ;;  %v6473_v27 = vld [vmem:[%s9010_s0 + $0x28] sm:$0xff]  }
   0xa   :  { %5977 = vmatpush3.bf16.msra.mxu1 %v6479_v10  ;;  %v6489_v26 = vld [vmem:[%s9013_s3 + $0x98] sm:$0xff]   ;;  %v6474_v28 = vld [vmem:[%s9010_s0 + $0x30] sm:$0xff]   ;;  %v6490_v30 = vld [vmem:[%s9013_s3 + $0x68] sm:$0xff]  }
   0xb   :  { %6383 = vmatpush3.bf16.msra.mxu0 %v6462_v2  ;;  %5978 = vmatprep.subr.bf16.mxu1 %v6481_v12  ;;  %v6475_v29 = vld [vmem:[%s9010_s0 + $0x38] sm:$0xff]   ;;  %v6491_v31 = vld [vmem:[%s9013_s3 + $0x28] sm:$0xff]   ;;  %v6492_v32 = vld [vmem:[%s9013_s3 + $0xa0] sm:$0xff]  }
   0xc   :  { %6384 = vmatprep.subr.bf16.mxu0 %v6463_v3  ;;  %v6493_v33 = vld [vmem:[%s9013_s3 + $0x70] sm:$0xff]   ;;  %v6495_v35 = vld [vmem:[%s9013_s3 + $0xa8] sm:$0xff]   ;;  %v6496_v36 = vld [vmem:[%s9013_s3 + $0x78] sm:$0xff]  }
   0xd   :  { %v6494_v34 = vld [vmem:[%s9013_s3 + $0x30] sm:$0xff]   ;;  %v6497_v37 = vld [vmem:[%s9013_s3 + $0x38] sm:$0xff]   ;;  %v6502_v40 = vld [vmem:[%s9015_s5 + $0x4] ss:$8 sps:$4 sm:$0xff]  }
   0xe   :  { %5979 = vmatpush3.bf16.msra.mxu1 %v6482_v14  ;;  %v6498_v38 = vld [vmem:[%s9013_s3 + $0xb0] sm:$0xff]   ;;  %v6499_v39 = vld [vmem:[%s9013_s3 + $0xb8] sm:$0xff]   ;;  %v7328_v41 = vld [vmem:[%s9012_s2] ss:$0 sm:$0xff] }
   0xf   :  { %6385 = vmatpush3.bf16.msra.mxu0 %v6463_v3  ;;  %5980 = vmatprep.subr.bf16.mxu1 %v6484_v15  ;;  %v7333_v42 = vld [vmem:[%s9012_s2 + $0x1] ss:$0 sm:$0xff]  ;;  %v6505_v0 = vld [vmem:[%s9015_s5 + $0x14] ss:$8 sps:$4 sm:$0xff]   ;;  %v6503_v9 = vld [vmem:[%s9015_s5 + $0x10] ss:$8 sps:$4 sm:$0xff]  }
  0x10   :  { %6386 = vmatprep.subr.bf16.mxu0 %v6464_v5  ;;  %v6500_v60 = vld [vmem:[%s9015_s5] ss:$8 sps:$4 sm:$0xff]   ;;  %v6508_v12 = vld [vmem:[%s9015_s5 + $0x24] ss:$8 sps:$4 sm:$0xff]  }
  0x12   :  { %5981 = vmatpush3.bf16.msra.mxu1 %v6485_v17 }
  0x13   :  { %6387 = vmatpush3.bf16.msra.mxu0 %v6464_v5  ;;  %5982 = vmatprep.subr.bf16.mxu1 %v6487_v19  ;;  %v6506_v19 = vld [vmem:[%s9015_s5 + $0x20] ss:$8 sps:$4 sm:$0xff]  }
  0x14   :  { %6388 = vmatprep.subr.bf16.mxu0 %v6465_v6 }
  0x16   :  { %5983 = vmatpush3.bf16.msra.mxu1 %v6488_v22 }
  0x17   :  { %6389 = vmatpush3.bf16.msra.mxu0 %v6465_v6  ;;  %5984 = vmatprep.subr.bf16.mxu1 %v6490_v30 }
  0x18   :  { %6390 = vmatprep.subr.bf16.mxu0 %v6466_v11 }
  0x1a   :  { %5985 = vmatpush3.bf16.msra.mxu1 %v6491_v31 }
  0x1b   :  { %6391 = vmatpush3.bf16.msra.mxu0 %v6466_v11  ;;  %5986 = vmatprep.subr.bf16.mxu1 %v6493_v33  ;;  %v7140_v11 = vmov 0  }
  0x1c   :  { %6392 = vmatprep.subr.bf16.mxu0 %v6467_v13 }
  0x1e   :  { %5987 = vmatpush3.bf16.msra.mxu1 %v6494_v34 }
  0x1f   :  { %6393 = vmatpush3.bf16.msra.mxu0 %v6467_v13  ;;  %5988 = vmatprep.subr.bf16.mxu1 %v6496_v36 }
  0x20   :  { %6410 = vmatprep.subr.bf16.mxu0 %v6480_v16 }
  0x22   :  { %6395 = vmatmul.mubr.bf16.vlgmr.msra.gmra.mrb[0].mxu0 %v6469_v18  ;;  %5989 = vmatpush3.bf16.msra.mxu1 %v6497_v37 }
  0x23   :  { %6398 = vmatprep.mubr.bf16.mxu0 %v6470_v20  ;;  %6411 = vmatpush3.bf16.msra.mxu0 %v6480_v16 }
  0x24   :  { %6412 = vmatprep.subr.bf16.mxu0 %v6483_v21  ;;  %979 = vmatprep.subr.bf16.mxu1 %v6502_v40 }
  0x27   :  { %6413 = vmatpush3.bf16.msra.mxu0 %v6483_v21 }
  0x28   :  { %6414 = vmatprep.subr.bf16.mxu0 %v6486_v23 }
  0x2a   :  { %6399 = vmatmul.mubr.bf16.gmra.mrb[4].mxu0 %v6471_v24 }
  0x2b   :  { %6402 = vmatprep.mubr.bf16.mxu0 %v6472_v25  ;;  %6415 = vmatpush3.bf16.msra.mxu0 %v6486_v23  ;;  %v6511_v23 = vld [vmem:[%s9015_s5 + $0x34] ss:$8 sps:$4 sm:$0xff]  }
  0x2c   :  { %6416 = vmatprep.subr.bf16.mxu0 %v6489_v26 }
  0x2f   :  { %6417 = vmatpush3.bf16.msra.mxu0 %v6489_v26 }
  0x30   :  { %6418 = vmatprep.subr.bf16.mxu0 %v6492_v32 }
  0x32   :  { %6403 = vmatmul.mubr.bf16.gmra.mrb[8].mxu0 %v6473_v27 }
  0x33   :  { %6406 = vmatprep.mubr.bf16.mxu0 %v6474_v28  ;;  %6419 = vmatpush3.bf16.msra.mxu0 %v6492_v32  ;;  %v6509_v32 = vld [vmem:[%s9015_s5 + $0x30] ss:$8 sps:$4 sm:$0xff]  }
  0x34   :  { %6420 = vmatprep.subr.bf16.mxu0 %v6495_v35 }
  0x37   :  { %6421 = vmatpush3.bf16.msra.mxu0 %v6495_v35  ;;  %v6514_v35 = vld [vmem:[%s9015_s5 + $0x44] ss:$8 sps:$4 sm:$0xff]  }
  0x38   :  { %6422 = vmatprep.subr.bf16.mxu0 %v6498_v38 }
  0x3a   :  { %6407 = vmatmul.mubr.bf16.gmra.mrb[12].mxu0 %v6475_v29 }
  0x3b   :  { %6423 = vmatpush3.bf16.msra.mxu0 %v6498_v38 }
  0x3c   :  { %6424 = vmatprep.subr.bf16.mxu0 %v6499_v39 }
  0x3f   :  { %6425 = vmatpush3.bf16.msra.mxu0 %v6499_v39 }
  0xf5   :  { %v6396_v43 = vpop.f32.mrb[0].mxu0 }
  0xf6   :  { %v273_v44 = vmul.f32 %v6396_v43, %v7328_v41  ;;  %v202_v45 = vpop.f32.mrb[1].mxu0  ;;  %v6512_v43 = vld [vmem:[%s9015_s5 + $0x40] ss:$8 sps:$4 sm:$0xff]  }
  0xf7   :  { %v271_v46 = vmul.f32 %v7328_v41, %v202_v45  ;;  %v6397_v47 = vpop.f32.mrb[2].mxu0 }
  0xf8   :  { %v293_v48 = vadd.f32 %v7333_v42, %v273_v44  ;;  %v274_v49 = vmul.f32 %v6397_v47, %v7328_v41  ;;  %v205_v50 = vpop.f32.mrb[3].mxu0  ;;  %v6517_v47 = vld [vmem:[%s9015_s5 + $0x54] ss:$8 sps:$4 sm:$0xff]  }
  0xf9   :  { %v272_v51 = vmul.f32 %v7328_v41, %v205_v50  ;;  %v291_v52 = vadd.f32 %v7333_v42, %v271_v46 }
  0xfa   :  { %v294_v53 = vadd.f32 %v7333_v42, %v274_v49  ;;  %v309_v54 = vmax.f32 %v293_v48, 0.0 }
  0xfb   :  { %v292_v55 = vadd.f32 %v7333_v42, %v272_v51  ;;  %v307_v57 = vmax.f32 %v291_v52, 0.0 }
  0xfc   :  { %v310_v56 = vmax.f32 %v294_v53, 0.0 }
  0xfd   :  { %v6400_v58 = vpop.f32.mrb[4].mxu0  ;;  %v308_v59 = vmax.f32 %v292_v55, 0.0 }
  0xfe   :  { %v277_v61 = vmul.f32 %v6400_v58, %v7328_v41  ;;  %v218_v62 = vpop.f32.mrb[5].mxu0  ;;  %v324_v63 = vpack.c.bf16 %v310_v56, %v309_v54  ;;  %v6515_v56 = vld [vmem:[%s9015_s5 + $0x50] ss:$8 sps:$4 sm:$0xff]  }
  0xff   :  { %v275_v1 = vmul.f32 %v7328_v41, %v218_v62  ;;  %v6401_v2 = vpop.f32.mrb[6].mxu0  ;;  %v323_v3 = vpack.c.bf16 %v308_v59, %v307_v57  ;;  %v6520_v59 = vld [vmem:[%s9015_s5 + $0x64] ss:$8 sps:$4 sm:$0xff]  }
 0x100   :  { %v297_v4 = vadd.f32 %v7333_v42, %v277_v61  ;;  %v278_v5 = vmul.f32 %v6401_v2, %v7328_v41  ;;  %v221_v6 = vpop.f32.mrb[7].mxu0  ;;  %6426 = vmatprep.mubr.bf16.mxu0 %v324_v63 }
 0x101   :  { %v295_v7 = vadd.f32 %v7333_v42, %v275_v1  ;;  %v276_v8 = vmul.f32 %v7328_v41, %v221_v6  ;;  %555 = vmatprep.mubr.bf16.mxu1 %v323_v3  ;;  %v6523_v1 = vld [vmem:[%s9015_s5 + $0x74] ss:$8 sps:$4 sm:$0xff]   ;;  %v6526_v3 = vld [vmem:[%s9015_s5 + $0x84] ss:$8 sps:$4 sm:$0xff]   ;;  %v6527_v6 = vld [vmem:[%s9015_s5 + $0x90] ss:$8 sps:$4 sm:$0xff]  }
 0x102   :  { %v298_v10 = vadd.f32 %v7333_v42, %v278_v5  ;;  %556 = vmatmul.mubr.bf16.vlgmr.msra.gmra.mrb[0].mxu1 %v7140_v11  ;;  %v313_v13 = vmax.f32 %v297_v4, 0.0  ;;  %v6524_v4 = vld [vmem:[%s9015_s5 + $0x80] ss:$8 sps:$4 sm:$0xff]   ;;  %v6529_v5 = vld [vmem:[%s9015_s5 + $0x94] ss:$8 sps:$4 sm:$0xff]  }
 0x103   :  { %v296_v14 = vadd.f32 %v7333_v42, %v276_v8  ;;  %980 = vmatpush1.bf16.msra.mxu1 %v6500_v60  ;;  %v311_v15 = vmax.f32 %v295_v7, 0.0  ;;  %v6532_v7 = vld [vmem:[%s9015_s5 + $0xa4] ss:$8 sps:$4 sm:$0xff]   ;;  %v6530_v8 = vld [vmem:[%s9015_s5 + $0xa0] ss:$8 sps:$4 sm:$0xff]  }
 0x104   :  { %v314_v16 = vmax.f32 %v298_v10, 0.0  ;;  %981 = vmatprep.subr.bf16.mxu1 %v6505_v0  ;;  %v6533_v10 = vld [vmem:[%s9015_s5 + $0xb0] ss:$8 sps:$4 sm:$0xff]  }
 0x105   :  { %v312_v17 = vmax.f32 %v296_v14, 0.0  ;;  %v6404_v18 = vpop.f32.mrb[8].mxu0 }
 0x106   :  { %v326_v20 = vpack.c.bf16 %v314_v16, %v313_v13  ;;  %v281_v21 = vmul.f32 %v6404_v18, %v7328_v41  ;;  %v234_v22 = vpop.f32.mrb[9].mxu0 }
 0x107   :  { %v279_v24 = vmul.f32 %v7328_v41, %v234_v22  ;;  %v6405_v25 = vpop.f32.mrb[10].mxu0  ;;  %v325_v26 = vpack.c.bf16 %v312_v17, %v311_v15  ;;  %982 = vmatpush1.bf16.msra.mxu1 %v6503_v9  ;;  %v6535_v9 = vld [vmem:[%s9015_s5 + $0xb4] ss:$8 sps:$4 sm:$0xff]  }
 0x108   :  { %v301_v27 = vadd.f32 %v7333_v42, %v281_v21  ;;  %v282_v28 = vmul.f32 %v6405_v25, %v7328_v41  ;;  %v237_v29 = vpop.f32.mrb[11].mxu0  ;;  %6427 = vmatmul.mubr.bf16.vlgmr.msra.gmra.mrb[16].mxu0 %v326_v20  ;;  %983 = vmatprep.subr.bf16.mxu1 %v6508_v12 }
 0x109   :  { %v299_v30 = vadd.f32 %v7333_v42, %v279_v24  ;;  %v280_v31 = vmul.f32 %v7328_v41, %v237_v29  ;;  %563 = vmatprep.mubr.bf16.mxu1 %v325_v26 }
 0x10a   :  { %v317_v33 = vmax.f32 %v301_v27, 0.0  ;;  %v302_v34 = vadd.f32 %v7333_v42, %v282_v28  ;;  %564 = vmatmul.mubr.bf16.gmra.mrb[4].mxu1 %v324_v63  ;;  %v6518_v63 = vld [vmem:[%s9015_s5 + $0x60] ss:$8 sps:$4 sm:$0xff]  }
 0x10b   :  { %v315_v36 = vmax.f32 %v299_v30, 0.0  ;;  %v300_v37 = vadd.f32 %v7333_v42, %v280_v31  ;;  %984 = vmatpush1.bf16.msra.mxu1 %v6506_v19 }
 0x10c   :  { %v318_v38 = vmax.f32 %v302_v34, 0.0  ;;  %985 = vmatprep.subr.bf16.mxu1 %v6511_v23 }
 0x10d   :  { %v316_v39 = vmax.f32 %v300_v37, 0.0  ;;  %v6408_v40 = vpop.f32.mrb[12].mxu0 }
 0x10e   :  { %v285_v44 = vmul.f32 %v6408_v40, %v7328_v41  ;;  %v250_v45 = vpop.f32.mrb[13].mxu0  ;;  %v328_v46 = vpack.c.bf16 %v318_v38, %v317_v33 }
 0x10f   :  { %v283_v48 = vmul.f32 %v7328_v41, %v250_v45  ;;  %v6409_v49 = vpop.f32.mrb[14].mxu0  ;;  %v327_v50 = vpack.c.bf16 %v316_v39, %v315_v36  ;;  %986 = vmatpush1.bf16.msra.mxu1 %v6509_v32 }
 0x110   :  { %v305_v51 = vadd.f32 %v7333_v42, %v285_v44  ;;  %v286_v52 = vmul.f32 %v6409_v49, %v7328_v41  ;;  %v253_v53 = vpop.f32.mrb[15].mxu0  ;;  %6430 = vmatprep.mubr.bf16.mxu0 %v328_v46  ;;  %987 = vmatprep.subr.bf16.mxu1 %v6514_v35 }
 0x111   :  { %v303_v54 = vadd.f32 %v7333_v42, %v283_v48  ;;  %v284_v55 = vmul.f32 %v7328_v41, %v253_v53  ;;  %571 = vmatprep.mubr.bf16.mxu1 %v327_v50 }
 0x112   :  { %v321_v57 = vmax.f32 %v305_v51, 0.0  ;;  %v306_v58 = vadd.f32 %v7333_v42, %v286_v52  ;;  %572 = vmatmul.mubr.bf16.gmra.mrb[8].mxu1 %v326_v20 }
 0x113   :  { %v319_v60 = vmax.f32 %v303_v54, 0.0  ;;  %v304_v61 = vadd.f32 %v7333_v42, %v284_v55  ;;  %988 = vmatpush1.bf16.msra.mxu1 %v6512_v43  ;;  %v6521_v42 = vld [vmem:[%s9015_s5 + $0x70] ss:$8 sps:$4 sm:$0xff]  }
 0x114   :  { %v322_v62 = vmax.f32 %v306_v58, 0.0  ;;  %989 = vmatprep.subr.bf16.mxu1 %v6517_v47 }
 0x115   :  { %v320_v41 = vmax.f32 %v304_v61, 0.0 }
 0x116   :  { %v330_v0 = vpack.c.bf16 %v322_v62, %v321_v57 }
 0x117   :  { %v329_v2 = vpack.c.bf16 %v320_v41, %v319_v60  ;;  %990 = vmatpush1.bf16.msra.mxu1 %v6515_v56 }
 0x118   :  { %6431 = vmatmul.mubr.bf16.gmra.mrb[20].mxu0 %v330_v0  ;;  %991 = vmatprep.subr.bf16.mxu1 %v6520_v59 }
 0x119   :  { %579 = vmatprep.mubr.bf16.mxu1 %v329_v2  ;;  %2322 = vmatprep.mubr.bf16.mxu0 %v7140_v11 }
 0x11a   :  { %580 = vmatmul.mubr.bf16.gmra.mrb[12].mxu1 %v328_v46 }
 0x11b   :  { %992 = vmatpush1.bf16.msra.mxu1 %v6518_v63 }
 0x11c   :  { %993 = vmatprep.subr.bf16.mxu1 %v6523_v1 }
 0x11f   :  { %994 = vmatpush1.bf16.msra.mxu1 %v6521_v42 }
 0x120   :  { %995 = vmatprep.subr.bf16.mxu1 %v6526_v3 }
 0x123   :  { %996 = vmatpush1.bf16.msra.mxu1 %v6524_v4 }
 0x124   :  { %997 = vmatprep.subr.bf16.mxu1 %v6529_v5 }
 0x127   :  { %998 = vmatpush1.bf16.msra.mxu1 %v6527_v6 }
 0x128   :  { %999 = vmatprep.subr.bf16.mxu1 %v6532_v7 }
 0x12b   :  { %1000 = vmatpush1.bf16.msra.mxu1 %v6530_v8 }
 0x12c   :  { %1001 = vmatprep.subr.bf16.mxu1 %v6535_v9 }
 0x12f   :  { %1002 = vmatpush1.bf16.msra.mxu1 %v6533_v10 }
 0x130   :  { %16 = vsyncpa [#allocation3], 0  ;;  %v6538_v12 = vld [vmem:[%s9015_s5 + $0xc4] ss:$8 sps:$4 sm:$0xff]   ;;  %v6536_v13 = vld [vmem:[%s9015_s5 + $0xc0] ss:$8 sps:$4 sm:$0xff]  }
 0x131   :  { %1003 = vmatprep.subr.bf16.mxu1 %v6538_v12  ;;  %v6541_v14 = vld [vmem:[%s9015_s5 + $0xd4] ss:$8 sps:$4 sm:$0xff]   ;;  %v6539_v15 = vld [vmem:[%s9015_s5 + $0xd0] ss:$8 sps:$4 sm:$0xff]   ;;  %v6544_v16 = vld [vmem:[%s9015_s5 + $0xe4] ss:$8 sps:$4 sm:$0xff]  }
 0x132   :  { %v6542_v17 = vld [vmem:[%s9015_s5 + $0xe0] ss:$8 sps:$4 sm:$0xff]   ;;  %v6547_v18 = vld [vmem:[%s9015_s5 + $0xf4] ss:$8 sps:$4 sm:$0xff]   ;;  %v6545_v19 = vld [vmem:[%s9015_s5 + $0xf0] ss:$8 sps:$4 sm:$0xff]  }
 0x133   :  { %1004 = vmatpush1.bf16.msra.mxu1 %v6536_v13  ;;  %v6550_v20 = vld [vmem:[%s9015_s5 + $0x104] ss:$8 sps:$4 sm:$0xff]   ;;  %v6572_v21 = vld [vmem:[%s9017_s7] ss:$16 sps:$4 sm:$0xff]  }
 0x134   :  { %1005 = vmatprep.subr.bf16.mxu1 %v6541_v14  ;;  %v6574_v22 = vld [vmem:[%s9017_s7 + $0x4] ss:$16 sps:$4 sm:$0xff]   ;;  %v6578_v24 = vld [vmem:[%s9017_s7 + $0x20] ss:$16 sps:$4 sm:$0xff]  }
 0x135   :  { %v6580_v23 = vld [vmem:[%s9017_s7 + $0x24] ss:$16 sps:$4 sm:$0xff]   ;;  %2290 = vmatprep.subr.bf16.mxu0 %v6574_v22  ;;  %v6584_v26 = vld [vmem:[%s9017_s7 + $0x40] ss:$16 sps:$4 sm:$0xff]  }
 0x136   :  { %2291 = vmatpush1.bf16.msra.mxu0 %v6572_v21  ;;  %v6586_v25 = vld [vmem:[%s9017_s7 + $0x44] ss:$16 sps:$4 sm:$0xff]   ;;  %v6590_v28 = vld [vmem:[%s9017_s7 + $0x60] ss:$16 sps:$4 sm:$0xff]  }
 0x137   :  { %1006 = vmatpush1.bf16.msra.mxu1 %v6539_v15  ;;  %2292 = vmatprep.subr.bf16.mxu0 %v6580_v23  ;;  %v6592_v27 = vld [vmem:[%s9017_s7 + $0x64] ss:$16 sps:$4 sm:$0xff]   ;;  %v6596_v30 = vld [vmem:[%s9017_s7 + $0x80] ss:$16 sps:$4 sm:$0xff]  }
 0x138   :  { %1007 = vmatprep.subr.bf16.mxu1 %v6544_v16  ;;  %v6598_v29 = vld [vmem:[%s9017_s7 + $0x84] ss:$16 sps:$4 sm:$0xff]   ;;  %v6602_v32 = vld [vmem:[%s9017_s7 + $0xa0] ss:$16 sps:$4 sm:$0xff]  }
 0x139   :  { %v6604_v31 = vld [vmem:[%s9017_s7 + $0xa4] ss:$16 sps:$4 sm:$0xff]   ;;  %v6608_v34 = vld [vmem:[%s9017_s7 + $0xc0] ss:$16 sps:$4 sm:$0xff]  }
 0x13a   :  { %2293 = vmatpush1.bf16.msra.mxu0 %v6578_v24  ;;  %v6610_v33 = vld [vmem:[%s9017_s7 + $0xc4] ss:$16 sps:$4 sm:$0xff]   ;;  %v6614_v36 = vld [vmem:[%s9017_s7 + $0xe0] ss:$16 sps:$4 sm:$0xff]  }
 0x13b   :  { %1008 = vmatpush1.bf16.msra.mxu1 %v6542_v17  ;;  %2294 = vmatprep.subr.bf16.mxu0 %v6586_v25  ;;  %v6616_v35 = vld [vmem:[%s9017_s7 + $0xe4] ss:$16 sps:$4 sm:$0xff]   ;;  %v6620_v38 = vld [vmem:[%s9017_s7 + $0x100] ss:$16 sps:$4 sm:$0xff]  }
 0x13c   :  { %1009 = vmatprep.subr.bf16.mxu1 %v6547_v18  ;;  %v6622_v37 = vld [vmem:[%s9017_s7 + $0x104] ss:$16 sps:$4 sm:$0xff]   ;;  %v6626_v40 = vld [vmem:[%s9017_s7 + $0x120] ss:$16 sps:$4 sm:$0xff]  }
 0x13d   :  { %v6628_v39 = vld [vmem:[%s9017_s7 + $0x124] ss:$16 sps:$4 sm:$0xff]   ;;  %v6632_v44 = vld [vmem:[%s9017_s7 + $0x140] ss:$16 sps:$4 sm:$0xff]  }
 0x13e   :  { %2295 = vmatpush1.bf16.msra.mxu0 %v6584_v26  ;;  %v6634_v43 = vld [vmem:[%s9017_s7 + $0x144] ss:$16 sps:$4 sm:$0xff]   ;;  %v6638_v46 = vld [vmem:[%s9017_s7 + $0x160] ss:$16 sps:$4 sm:$0xff]  }
 0x13f   :  { %1010 = vmatpush1.bf16.msra.mxu1 %v6545_v19  ;;  %2296 = vmatprep.subr.bf16.mxu0 %v6592_v27  ;;  %v6640_v45 = vld [vmem:[%s9017_s7 + $0x164] ss:$16 sps:$4 sm:$0xff]   ;;  %v6644_v48 = vld [vmem:[%s9017_s7 + $0x180] ss:$16 sps:$4 sm:$0xff]  }
 0x140   :  { %1032 = vmatprep.subr.bf16.mxu1 %v6550_v20  ;;  %v6646_v47 = vld [vmem:[%s9017_s7 + $0x184] ss:$16 sps:$4 sm:$0xff]   ;;  %v6650_v50 = vld [vmem:[%s9017_s7 + $0x1a0] ss:$16 sps:$4 sm:$0xff]  }
 0x141   :  { %v6652_v49 = vld [vmem:[%s9017_s7 + $0x1a4] ss:$16 sps:$4 sm:$0xff]   ;;  %v6656_v52 = vld [vmem:[%s9017_s7 + $0x1c0] ss:$16 sps:$4 sm:$0xff]  }
 0x142   :  { %2297 = vmatpush1.bf16.msra.mxu0 %v6590_v28  ;;  %v6658_v51 = vld [vmem:[%s9017_s7 + $0x1c4] ss:$16 sps:$4 sm:$0xff]   ;;  %v6662_v54 = vld [vmem:[%s9017_s7 + $0x1e0] ss:$16 sps:$4 sm:$0xff]  }
 0x143   :  { %2298 = vmatprep.subr.bf16.mxu0 %v6598_v29  ;;  %v6664_v53 = vld [vmem:[%s9017_s7 + $0x1e4] ss:$16 sps:$4 sm:$0xff]   ;;  %v6668_v56 = vld [vmem:[%s9017_s7 + $0x200] ss:$16 sps:$4 sm:$0xff]  }
 0x144   :  { %v6670_v55 = vld [vmem:[%s9017_s7 + $0x204] ss:$16 sps:$4 sm:$0xff]   ;;  %v6674_v59 = vld [vmem:[%s9017_s7 + $0x220] ss:$16 sps:$4 sm:$0xff]  }
 0x145   :  { %v6676_v57 = vld [vmem:[%s9017_s7 + $0x224] ss:$16 sps:$4 sm:$0xff]   ;;  %v6680_v1 = vld [vmem:[%s9017_s7 + $0x240] ss:$16 sps:$4 sm:$0xff]  }
 0x146   :  { %2299 = vmatpush1.bf16.msra.mxu0 %v6596_v30  ;;  %v6682_v61 = vld [vmem:[%s9017_s7 + $0x244] ss:$16 sps:$4 sm:$0xff]   ;;  %v7586_v4 = vld [vmem:[%s9014_s4] ss:$0 sm:$0xff]  ;;  %v7594_v9 = vld [vmem:[%s9014_s4 + $0x1] ss:$0 sm:$0xff] }
 0x147   :  { %2300 = vmatprep.subr.bf16.mxu0 %v6604_v31  ;;  %v6688_v2 = vld [vmem:[%s9017_s7 + $0x264] ss:$16 sps:$4 sm:$0xff]   ;;  %v6686_v8 = vld [vmem:[%s9017_s7 + $0x260] ss:$16 sps:$4 sm:$0xff]  }
 0x148   :  { %v6694_v13 = vld [vmem:[%s9017_s7 + $0x284] ss:$16 sps:$4 sm:$0xff]   ;;  %v6692_v23 = vld [vmem:[%s9017_s7 + $0x280] ss:$16 sps:$4 sm:$0xff]  }
 0x149   :  { %v6700_v24 = vld [vmem:[%s9017_s7 + $0x2a4] ss:$16 sps:$4 sm:$0xff]  }
 0x14a   :  { %2301 = vmatpush1.bf16.msra.mxu0 %v6602_v32 }
 0x14b   :  { %2302 = vmatprep.subr.bf16.mxu0 %v6610_v33  ;;  %v6698_v33 = vld [vmem:[%s9017_s7 + $0x2a0] ss:$16 sps:$4 sm:$0xff]  }
 0x14e   :  { %2303 = vmatpush1.bf16.msra.mxu0 %v6608_v34 }
 0x14f   :  { %2304 = vmatprep.subr.bf16.mxu0 %v6616_v35  ;;  %v6706_v35 = vld [vmem:[%s9017_s7 + $0x2c4] ss:$16 sps:$4 sm:$0xff]  }
 0x152   :  { %2305 = vmatpush1.bf16.msra.mxu0 %v6614_v36 }
 0x153   :  { %2306 = vmatprep.subr.bf16.mxu0 %v6622_v37 }
 0x156   :  { %2307 = vmatpush1.bf16.msra.mxu0 %v6620_v38 }
 0x157   :  { %2308 = vmatprep.subr.bf16.mxu0 %v6628_v39  ;;  %v6548_v39 = vld [vmem:[%s9015_s5 + $0x100] ss:$8 sps:$4 sm:$0xff]  }
 0x15a   :  { %2309 = vmatpush1.bf16.msra.mxu0 %v6626_v40 }
 0x15b   :  { %2310 = vmatprep.subr.bf16.mxu0 %v6634_v43 }
 0x15e   :  { %2311 = vmatpush1.bf16.msra.mxu0 %v6632_v44  ;;  %v6553_v44 = vld [vmem:[%s9015_s5 + $0x114] ss:$8 sps:$4 sm:$0xff]  }
 0x15f   :  { %2312 = vmatprep.subr.bf16.mxu0 %v6640_v45 }
 0x162   :  { %2313 = vmatpush1.bf16.msra.mxu0 %v6638_v46 }
 0x163   :  { %2314 = vmatprep.subr.bf16.mxu0 %v6646_v47 }
 0x166   :  { %2315 = vmatpush1.bf16.msra.mxu0 %v6644_v48  ;;  %v6704_v48 = vld [vmem:[%s9017_s7 + $0x2c0] ss:$16 sps:$4 sm:$0xff]  }
 0x167   :  { %2316 = vmatprep.subr.bf16.mxu0 %v6652_v49  ;;  %v6712_v49 = vld [vmem:[%s9017_s7 + $0x2e4] ss:$16 sps:$4 sm:$0xff]  }
 0x16a   :  { %2317 = vmatpush1.bf16.msra.mxu0 %v6650_v50 }
 0x16b   :  { %2318 = vmatprep.subr.bf16.mxu0 %v6658_v51  ;;  %v6551_v51 = vld [vmem:[%s9015_s5 + $0x110] ss:$8 sps:$4 sm:$0xff]  }
 0x16e   :  { %2319 = vmatpush1.bf16.msra.mxu0 %v6656_v52 }
 0x16f   :  { %2320 = vmatprep.subr.bf16.mxu0 %v6664_v53 }
 0x172   :  { %2321 = vmatpush1.bf16.msra.mxu0 %v6662_v54  ;;  %v6556_v54 = vld [vmem:[%s9015_s5 + $0x124] ss:$8 sps:$4 sm:$0xff]  }
 0x173   :  { %2333 = vmatprep.subr.bf16.mxu0 %v6670_v55 }
 0x175   :  { %2323 = vmatmul.mubr.bf16.vlgmr.msra.gmra.mrb[24].mxu0 %v7140_v11 }
 0x176   :  { %2334 = vmatpush1.bf16.msra.mxu0 %v6668_v56 }
 0x177   :  { %2335 = vmatprep.subr.bf16.mxu0 %v6676_v57 }
 0x17a   :  { %2336 = vmatpush1.bf16.msra.mxu0 %v6674_v59 }
 0x17b   :  { %2337 = vmatprep.subr.bf16.mxu0 %v6682_v61  ;;  %v6718_v61 = vld [vmem:[%s9017_s7 + $0x304] ss:$16 sps:$4 sm:$0xff]  }
 0x17e   :  { %2338 = vmatpush1.bf16.msra.mxu0 %v6680_v1  ;;  %v6554_v1 = vld [vmem:[%s9015_s5 + $0x120] ss:$8 sps:$4 sm:$0xff]  }
 0x17f   :  { %2339 = vmatprep.subr.bf16.mxu0 %v6688_v2 }
 0x182   :  { %2340 = vmatpush1.bf16.msra.mxu0 %v6686_v8  ;;  %v6716_v8 = vld [vmem:[%s9017_s7 + $0x300] ss:$16 sps:$4 sm:$0xff]  }
 0x183   :  { %2341 = vmatprep.subr.bf16.mxu0 %v6694_v13 }
 0x186   :  { %2342 = vmatpush1.bf16.msra.mxu0 %v6692_v23 }
 0x187   :  { %2343 = vmatprep.subr.bf16.mxu0 %v6700_v24  ;;  %v6560_v24 = vld [vmem:[%s9015_s5 + $0x140] ss:$8 sps:$4 sm:$0xff]  }
 0x18a   :  { %2344 = vmatpush1.bf16.msra.mxu0 %v6698_v33  ;;  %v6742_v33 = vld [vmem:[%s9017_s7 + $0x384] ss:$16 sps:$4 sm:$0xff]  }
 0x18b   :  { %2345 = vmatprep.subr.bf16.mxu0 %v6706_v35  ;;  %v6571_v35 = vld [vmem:[%s9015_s5 + $0x174] ss:$8 sps:$4 sm:$0xff]  }
 0x18e   :  { %2346 = vmatpush1.bf16.msra.mxu0 %v6704_v48  ;;  %v6601_v48 = vld [vmem:[%s9017_s7 + $0x8c] ss:$16 sps:$4 sm:$0xff]  }
 0x18f   :  { %2347 = vmatprep.subr.bf16.mxu0 %v6712_v49  ;;  %v6599_v49 = vld [vmem:[%s9017_s7 + $0x88] ss:$16 sps:$4 sm:$0xff]  }
 0x1d5   :  { %v5990_v58 = vpop.f32.mrb[0].mxu1 }
 0x1d6   :  { %v5991_v60 = vpop.f32.mrb[1].mxu1 }
 0x1d7   :  { %v5992_v62 = vadd.f32 %v5991_v60, %v5990_v58  ;;  %v5993_v41 = vpop.f32.mrb[2].mxu1  ;;  %v6710_v58 = vld [vmem:[%s9017_s7 + $0x2e0] ss:$16 sps:$4 sm:$0xff]  }
 0x1d8   :  { %v5994_v63 = vpop.f32.mrb[3].mxu1  ;;  %2348 = vmatpush1.bf16.msra.mxu0 %v6710_v58  ;;  %v6631_v58 = vld [vmem:[%s9017_s7 + $0x12c] ss:$16 sps:$4 sm:$0xff]  }
 0x1d9   :  { %v5995_v0 = vadd.f32 %v5994_v63, %v5993_v41  ;;  %2349 = vmatprep.subr.bf16.mxu0 %v6718_v61  ;;  %v6635_v61 = vld [vmem:[%s9017_s7 + $0x148] ss:$16 sps:$4 sm:$0xff]  }
 0x1db   :  { %v6428_v42 = vpop.f32.mrb[16].mxu0 }
 0x1dc   :  { %v622_v3 = vpop.f32.mrb[17].mxu0  ;;  %2350 = vmatpush1.bf16.msra.mxu0 %v6716_v8  ;;  %v6671_v8 = vld [vmem:[%s9017_s7 + $0x208] ss:$16 sps:$4 sm:$0xff]  }
 0x1dd   :  { %v623_v5 = vadd.f32 %v5992_v62, %v622_v3  ;;  %v5996_v6 = vpop.f32.mrb[4].mxu1  ;;  %v6429_v7 = vpop.f32.mrb[18].mxu0 }
 0x1de   :  { %v5997_v10 = vpop.f32.mrb[5].mxu1  ;;  %v625_v12 = vpop.f32.mrb[19].mxu0 }
 0x1df   :  { %v659_v14 = vmul.f32 %v7586_v4, %v623_v5  ;;  %v5998_v15 = vadd.f32 %v5997_v10, %v5996_v6  ;;  %v626_v16 = vadd.f32 %v5995_v0, %v625_v12  ;;  %v5999_v17 = vpop.f32.mrb[6].mxu1  ;;  %v6724_v10 = vld [vmem:[%s9017_s7 + $0x324] ss:$16 sps:$4 sm:$0xff]  }
 0x1e0   :  { %v6000_v18 = vpop.f32.mrb[7].mxu1  ;;  %2351 = vmatprep.subr.bf16.mxu0 %v6724_v10  ;;  %v6679_v10 = vld [vmem:[%s9017_s7 + $0x22c] ss:$16 sps:$4 sm:$0xff]  }
 0x1e1   :  { %v671_v19 = vadd.f32 %v7594_v9, %v659_v14  ;;  %v631_v20 = vadd.f32 %v6428_v42, %v5998_v15  ;;  %v660_v21 = vmul.f32 %v7586_v4, %v626_v16  ;;  %v6001_v22 = vadd.f32 %v6000_v18, %v5999_v17  ;;  %v6559_v42 = vld [vmem:[%s9015_s5 + $0x134] ss:$8 sps:$4 sm:$0xff]   ;;  %v6557_v15 = vld [vmem:[%s9015_s5 + $0x130] ss:$8 sps:$4 sm:$0xff]   ;;  %v6562_v16 = vld [vmem:[%s9015_s5 + $0x144] ss:$8 sps:$4 sm:$0xff]  }
 0x1e3   :  { %v661_v25 = vmul.f32 %v7586_v4, %v631_v20  ;;  %v672_v26 = vadd.f32 %v7594_v9, %v660_v21  ;;  %v634_v27 = vadd.f32 %v6429_v7, %v6001_v22  ;;  %v679_v28 = vmax.f32 %v671_v19, 0.0  ;;  %v6722_v21 = vld [vmem:[%s9017_s7 + $0x320] ss:$16 sps:$4 sm:$0xff]   ;;  %v6730_v22 = vld [vmem:[%s9017_s7 + $0x344] ss:$16 sps:$4 sm:$0xff]  }
 0x1e4   :  { %2352 = vmatpush1.bf16.msra.mxu0 %v6722_v21  ;;  %v6709_v21 = vld [vmem:[%s9017_s7 + $0x2cc] ss:$16 sps:$4 sm:$0xff]  }
 0x1e5   :  { %v680_v29 = vmax.f32 %v672_v26, 0.0  ;;  %v662_v30 = vmul.f32 %v7586_v4, %v634_v27  ;;  %v6002_v31 = vpop.f32.mrb[8].mxu1  ;;  %v673_v32 = vadd.f32 %v7594_v9, %v661_v25  ;;  %v6565_v25 = vld [vmem:[%s9015_s5 + $0x154] ss:$8 sps:$4 sm:$0xff]   ;;  %2353 = vmatprep.subr.bf16.mxu0 %v6730_v22  ;;  %v6746_v22 = vld [vmem:[%s9017_s7 + $0x3a0] ss:$16 sps:$4 sm:$0xff]  }
 0x1e6   :  { %v6003_v34 = vpop.f32.mrb[9].mxu1 }
 0x1e7   :  { %v6004_v36 = vadd.f32 %v6003_v34, %v6002_v31  ;;  %v6005_v37 = vpop.f32.mrb[10].mxu1  ;;  %v687_v38 = vpack.c.bf16 %v680_v29, %v679_v28  ;;  %v674_v40 = vadd.f32 %v7594_v9, %v662_v30  ;;  %v681_v46 = vmax.f32 %v673_v32, 0.0  ;;  %v6728_v28 = vld [vmem:[%s9017_s7 + $0x340] ss:$16 sps:$4 sm:$0xff]   ;;  %v6568_v31 = vld [vmem:[%s9015_s5 + $0x164] ss:$8 sps:$4 sm:$0xff]  }
 0x1e8   :  { %v6006_v43 = vpop.f32.mrb[11].mxu1  ;;  %v6563_v29 = vld [vmem:[%s9015_s5 + $0x150] ss:$8 sps:$4 sm:$0xff]   ;;  %2354 = vmatpush1.bf16.msra.mxu0 %v6728_v28  ;;  %v6566_v34 = vld [vmem:[%s9015_s5 + $0x160] ss:$8 sps:$4 sm:$0xff]  }
 0x1e9   :  { %v6007_v45 = vadd.f32 %v6006_v43, %v6005_v37  ;;  %1011 = vmatprep.mubr.bf16.mxu1 %v687_v38  ;;  %v682_v47 = vmax.f32 %v674_v40, 0.0  ;;  %v6734_v32 = vld [vmem:[%s9017_s7 + $0x360] ss:$16 sps:$4 sm:$0xff]   ;;  %v6577_v38 = vld [vmem:[%s9017_s7 + $0xc] ss:$16 sps:$4 sm:$0xff]  }
 0x1ea   :  { %1012 = vmatmul.mubr.bf16.vlgmr.msra.gmra.mrb[16].mxu1 %v7140_v11  ;;  %v6569_v37 = vld [vmem:[%s9015_s5 + $0x170] ss:$8 sps:$4 sm:$0xff]   ;;  %v6583_v40 = vld [vmem:[%s9017_s7 + $0x2c] ss:$16 sps:$4 sm:$0xff]  }
 0x1eb   :  { %1033 = vmatpush1.bf16.msra.mxu1 %v6548_v39  ;;  %v6432_v50 = vpop.f32.mrb[20].mxu0  ;;  %v7635_v52 = vpack.c.bf16 %v682_v47, %v681_v46  ;;  %v6575_v39 = vld [vmem:[%s9017_s7 + $0x8] ss:$16 sps:$4 sm:$0xff]   ;;  %v6595_v46 = vld [vmem:[%s9017_s7 + $0x6c] ss:$16 sps:$4 sm:$0xff]  }
 0x1ec   :  { %v638_v53 = vpop.f32.mrb[21].mxu0  ;;  %1034 = vmatprep.subr.bf16.mxu1 %v6553_v44  ;;  %v6581_v43 = vld [vmem:[%s9017_s7 + $0x28] ss:$16 sps:$4 sm:$0xff]   ;;  %v6589_v44 = vld [vmem:[%s9017_s7 + $0x4c] ss:$16 sps:$4 sm:$0xff]  }
 0x1ed   :  { %v639_v55 = vadd.f32 %v6004_v36, %v638_v53  ;;  %v6008_v56 = vpop.f32.mrb[12].mxu1  ;;  %v6433_v57 = vpop.f32.mrb[22].mxu0  ;;  %v6740_v36 = vld [vmem:[%s9017_s7 + $0x380] ss:$16 sps:$4 sm:$0xff]   ;;  %v6593_v47 = vld [vmem:[%s9017_s7 + $0x68] ss:$16 sps:$4 sm:$0xff]  }
 0x1ee   :  { %v6009_v59 = vpop.f32.mrb[13].mxu1  ;;  %v641_v60 = vpop.f32.mrb[23].mxu0  ;;  %v6611_v53 = vld [vmem:[%s9017_s7 + $0xc8] ss:$16 sps:$4 sm:$0xff]   ;;  %v6721_v28 = vld [vmem:[%s9017_s7 + $0x30c] ss:$16 sps:$4 sm:$0xff]  }
 0x1ef   :  { %v663_v62 = vmul.f32 %v7586_v4, %v639_v55  ;;  %v6010_v41 = vadd.f32 %v6009_v59, %v6008_v56  ;;  %v642_v63 = vadd.f32 %v6007_v45, %v641_v60  ;;  %1035 = vmatpush1.bf16.msra.mxu1 %v6551_v51  ;;  %v6011_v0 = vpop.f32.mrb[14].mxu1  ;;  %v6587_v45 = vld [vmem:[%s9017_s7 + $0x48] ss:$16 sps:$4 sm:$0xff]   ;;  %v6625_v56 = vld [vmem:[%s9017_s7 + $0x10c] ss:$16 sps:$4 sm:$0xff]  }
 0x1f0   :  { %v6012_v2 = vpop.f32.mrb[15].mxu1  ;;  %1036 = vmatprep.subr.bf16.mxu1 %v6556_v54  ;;  %v6605_v51 = vld [vmem:[%s9017_s7 + $0xa8] ss:$16 sps:$4 sm:$0xff]   ;;  %v6619_v54 = vld [vmem:[%s9017_s7 + $0xec] ss:$16 sps:$4 sm:$0xff]  }
 0x1f1   :  { %v675_v3 = vadd.f32 %v7594_v9, %v663_v62  ;;  %v647_v5 = vadd.f32 %v6432_v50, %v6010_v41  ;;  %v664_v6 = vmul.f32 %v7586_v4, %v642_v63  ;;  %v6013_v7 = vadd.f32 %v6012_v2, %v6011_v0  ;;  %v6607_v50 = vld [vmem:[%s9017_s7 + $0xac] ss:$16 sps:$4 sm:$0xff]   ;;  %v6617_v55 = vld [vmem:[%s9017_s7 + $0xe8] ss:$16 sps:$4 sm:$0xff]  }
 0x1f2   :  { %v6629_v59 = vld [vmem:[%s9017_s7 + $0x128] ss:$16 sps:$4 sm:$0xff]   ;;  %v6637_v60 = vld [vmem:[%s9017_s7 + $0x14c] ss:$16 sps:$4 sm:$0xff]  }
 0x1f3   :  { %v665_v12 = vmul.f32 %v7586_v4, %v647_v5  ;;  %v676_v13 = vadd.f32 %v7594_v9, %v664_v6  ;;  %v650_v14 = vadd.f32 %v6433_v57, %v6013_v7  ;;  %1037 = vmatpush1.bf16.msra.mxu1 %v6554_v1  ;;  %v683_v17 = vmax.f32 %v675_v3, 0.0  ;;  %v6623_v57 = vld [vmem:[%s9017_s7 + $0x108] ss:$16 sps:$4 sm:$0xff]   ;;  %v6643_v62 = vld [vmem:[%s9017_s7 + $0x16c] ss:$16 sps:$4 sm:$0xff]  }
 0x1f4   :  { %1038 = vmatprep.subr.bf16.mxu1 %v6559_v42  ;;  %v6641_v41 = vld [vmem:[%s9017_s7 + $0x168] ss:$16 sps:$4 sm:$0xff]   ;;  %v6649_v63 = vld [vmem:[%s9017_s7 + $0x18c] ss:$16 sps:$4 sm:$0xff]  }
 0x1f5   :  { %v684_v18 = vmax.f32 %v676_v13, 0.0  ;;  %v666_v19 = vmul.f32 %v7586_v4, %v650_v14  ;;  %v677_v20 = vadd.f32 %v7594_v9, %v665_v12  ;;  %v6647_v0 = vld [vmem:[%s9017_s7 + $0x188] ss:$16 sps:$4 sm:$0xff]   ;;  %v6655_v1 = vld [vmem:[%s9017_s7 + $0x1ac] ss:$16 sps:$4 sm:$0xff]  }
 0x1f6   :  { %v6653_v2 = vld [vmem:[%s9017_s7 + $0x1a8] ss:$16 sps:$4 sm:$0xff]   ;;  %v6661_v42 = vld [vmem:[%s9017_s7 + $0x1cc] ss:$16 sps:$4 sm:$0xff]  }
 0x1f7   :  { %1039 = vmatpush1.bf16.msra.mxu1 %v6557_v15  ;;  %v689_v23 = vpack.c.bf16 %v684_v18, %v683_v17  ;;  %v678_v4 = vadd.f32 %v7594_v9, %v666_v19  ;;  %v685_v26 = vmax.f32 %v677_v20, 0.0  ;;  %v6736_v9 = vld [vmem:[%s9017_s7 + $0x364] ss:$16 sps:$4 sm:$0xff]   ;;  %v6659_v3 = vld [vmem:[%s9017_s7 + $0x1c8] ss:$16 sps:$4 sm:$0xff]  }
 0x1f8   :  { %1040 = vmatprep.subr.bf16.mxu1 %v6562_v16  ;;  %2355 = vmatprep.subr.bf16.mxu0 %v6736_v9  ;;  %v6667_v5 = vld [vmem:[%s9017_s7 + $0x1ec] ss:$16 sps:$4 sm:$0xff]   ;;  %v6665_v6 = vld [vmem:[%s9017_s7 + $0x1e8] ss:$16 sps:$4 sm:$0xff]   ;;  %v6748_v20 = vld [vmem:[%s9017_s7 + $0x3a4] ss:$16 sps:$4 sm:$0xff]  }
 0x1f9   :  { %1021 = vmatprep.mubr.bf16.mxu1 %v689_v23  ;;  %v686_v27 = vmax.f32 %v678_v4, 0.0  ;;  %2356 = vmatpush1.bf16.msra.mxu0 %v6734_v32  ;;  %v6673_v7 = vld [vmem:[%s9017_s7 + $0x20c] ss:$16 sps:$4 sm:$0xff]   ;;  %v6677_v12 = vld [vmem:[%s9017_s7 + $0x228] ss:$16 sps:$4 sm:$0xff]  }
 0x1fa   :  { %1022 = vmatmul.mubr.bf16.gmra.mrb[20].mxu1 %v7635_v52  ;;  %2357 = vmatprep.subr.bf16.mxu0 %v6742_v33  ;;  %v6685_v13 = vld [vmem:[%s9017_s7 + $0x24c] ss:$16 sps:$4 sm:$0xff]   ;;  %v6683_v14 = vld [vmem:[%s9017_s7 + $0x248] ss:$16 sps:$4 sm:$0xff]   ;;  %v6758_v9 = vld [vmem:[%s9017_s7 + $0x3e0] ss:$16 sps:$4 sm:$0xff]  }
 0x1fb   :  { %1041 = vmatpush1.bf16.msra.mxu1 %v6560_v24  ;;  %1064 = vmatprep.mubr.bf16.mxu1 %v7140_v11  ;;  %v690_v30 = vpack.c.bf16 %v686_v27, %v685_v26  ;;  %v6689_v15 = vld [vmem:[%s9017_s7 + $0x268] ss:$16 sps:$4 sm:$0xff]   ;;  %v6697_v16 = vld [vmem:[%s9017_s7 + $0x28c] ss:$16 sps:$4 sm:$0xff]   ;;  %v6754_v24 = vld [vmem:[%s9017_s7 + $0x3c4] ss:$16 sps:$4 sm:$0xff]  }
 0x1fc   :  { %1042 = vmatprep.subr.bf16.mxu1 %v6565_v25  ;;  %v6695_v17 = vld [vmem:[%s9017_s7 + $0x288] ss:$16 sps:$4 sm:$0xff]   ;;  %v6703_v18 = vld [vmem:[%s9017_s7 + $0x2ac] ss:$16 sps:$4 sm:$0xff]   ;;  %v6752_v25 = vld [vmem:[%s9017_s7 + $0x3c0] ss:$16 sps:$4 sm:$0xff]  }
 0x1fd   :  { %2358 = vmatpush1.bf16.msra.mxu0 %v6740_v36  ;;  %v6701_v19 = vld [vmem:[%s9017_s7 + $0x2a8] ss:$16 sps:$4 sm:$0xff]   ;;  %v6715_v4 = vld [vmem:[%s9017_s7 + $0x2ec] ss:$16 sps:$4 sm:$0xff]   ;;  %v6760_v27 = vld [vmem:[%s9017_s7 + $0x3e4] ss:$16 sps:$4 sm:$0xff]  }
 0x1fe   :  { %2359 = vmatprep.subr.bf16.mxu0 %v6748_v20  ;;  %v6707_v23 = vld [vmem:[%s9017_s7 + $0x2c8] ss:$16 sps:$4 sm:$0xff]   ;;  %v6733_v33 = vld [vmem:[%s9017_s7 + $0x34c] ss:$16 sps:$4 sm:$0xff]  }
 0x1ff   :  { %1043 = vmatpush1.bf16.msra.mxu1 %v6563_v29  ;;  %v6713_v26 = vld [vmem:[%s9017_s7 + $0x2e8] ss:$16 sps:$4 sm:$0xff]  }
 0x200   :  { %1044 = vmatprep.subr.bf16.mxu1 %v6568_v31  ;;  %v6719_v29 = vld [vmem:[%s9017_s7 + $0x308] ss:$16 sps:$4 sm:$0xff]   ;;  %v6727_v31 = vld [vmem:[%s9017_s7 + $0x32c] ss:$16 sps:$4 sm:$0xff]  }
 0x201   :  { %2360 = vmatpush1.bf16.msra.mxu0 %v6746_v22  ;;  %v6725_v32 = vld [vmem:[%s9017_s7 + $0x328] ss:$16 sps:$4 sm:$0xff]   ;;  %v6772_v22 = vld [vmem:[%s9017_s7 + $0x424] ss:$16 sps:$4 sm:$0xff]  }
 0x202   :  { %2361 = vmatprep.subr.bf16.mxu0 %v6754_v24  ;;  %v6737_v36 = vld [vmem:[%s9017_s7 + $0x368] ss:$16 sps:$4 sm:$0xff]  }
 0x203   :  { %1045 = vmatpush1.bf16.msra.mxu1 %v6566_v34  ;;  %v6731_v34 = vld [vmem:[%s9017_s7 + $0x348] ss:$16 sps:$4 sm:$0xff]  }
 0x204   :  { %1046 = vmatprep.subr.bf16.mxu1 %v6571_v35  ;;  %v6739_v35 = vld [vmem:[%s9017_s7 + $0x36c] ss:$16 sps:$4 sm:$0xff]  }
 0x205   :  { %2362 = vmatpush1.bf16.msra.mxu0 %v6752_v25 }
 0x206   :  { %2363 = vmatprep.subr.bf16.mxu0 %v6760_v27  ;;  %v6770_v27 = vld [vmem:[%s9017_s7 + $0x420] ss:$16 sps:$4 sm:$0xff]  }
 0x207   :  { %1047 = vmatpush1.bf16.msra.mxu1 %v6569_v37  ;;  %v6745_v37 = vld [vmem:[%s9017_s7 + $0x38c] ss:$16 sps:$4 sm:$0xff]  }
 0x208   :  { %2419 = vmatprep.subr.bf16.mxu1 %v6577_v38  ;;  %v6743_v38 = vld [vmem:[%s9017_s7 + $0x388] ss:$16 sps:$4 sm:$0xff]  }
 0x209   :  { %2364 = vmatpush1.bf16.msra.mxu0 %v6758_v9 }
 0x20a   :  { %1065 = vmatmul.mubr.bf16.vlgmr.msra.gmra.mrb[16].mxu1 %v7635_v52  ;;  %v6613_v52 = vld [vmem:[%s9017_s7 + $0xcc] ss:$16 sps:$4 sm:$0xff]  }
 0x20b   :  { %1074 = vmatprep.mubr.bf16.mxu1 %v7140_v11  ;;  %2420 = vmatpush1.bf16.msra.mxu1 %v6575_v39  ;;  %v6751_v39 = vld [vmem:[%s9017_s7 + $0x3ac] ss:$16 sps:$4 sm:$0xff]  }
 0x20c   :  { %2421 = vmatprep.subr.bf16.mxu1 %v6583_v40  ;;  %v6749_v40 = vld [vmem:[%s9017_s7 + $0x3a8] ss:$16 sps:$4 sm:$0xff]  }
 0x20f   :  { %2422 = vmatpush1.bf16.msra.mxu1 %v6581_v43  ;;  %v6757_v43 = vld [vmem:[%s9017_s7 + $0x3cc] ss:$16 sps:$4 sm:$0xff]  }
 0x210   :  { %2423 = vmatprep.subr.bf16.mxu1 %v6589_v44  ;;  %v6755_v44 = vld [vmem:[%s9017_s7 + $0x3c8] ss:$16 sps:$4 sm:$0xff]  }
 0x212   :  { %1075 = vmatmul.mubr.bf16.gmra.mrb[20].mxu1 %v690_v30  ;;  %v6766_v30 = vld [vmem:[%s9017_s7 + $0x404] ss:$16 sps:$4 sm:$0xff]  }
 0x213   :  { %2424 = vmatpush1.bf16.msra.mxu1 %v6587_v45  ;;  %2451 = vmatprep.mubr.bf16.mxu1 %v7140_v11  ;;  %v6763_v45 = vld [vmem:[%s9017_s7 + $0x3ec] ss:$16 sps:$4 sm:$0xff]  }
 0x214   :  { %2425 = vmatprep.subr.bf16.mxu1 %v6595_v46  ;;  %2376 = vmatprep.subr.bf16.mxu0 %v6766_v30  ;;  %v6761_v46 = vld [vmem:[%s9017_s7 + $0x3e8] ss:$16 sps:$4 sm:$0xff]   ;;  %v6778_v30 = vld [vmem:[%s9017_s7 + $0x444] ss:$16 sps:$4 sm:$0xff]  }
 0x217   :  { %2426 = vmatpush1.bf16.msra.mxu1 %v6593_v47  ;;  %v6769_v47 = vld [vmem:[%s9017_s7 + $0x40c] ss:$16 sps:$4 sm:$0xff]  }
 0x218   :  { %2427 = vmatprep.subr.bf16.mxu1 %v6601_v48  ;;  %v1089_v48 = vlaneseq }
 0x21b   :  { %2428 = vmatpush1.bf16.msra.mxu1 %v6599_v49  ;;  %v7936_v49 = vshrl.u32 %v1089_v48, 7  ;;  %v6796_v48 = vld [vmem:[%s9017_s7 + $0x4a4] ss:$16 sps:$4 sm:$0xff]  }
 0x21c   :  { %2429 = vmatprep.subr.bf16.mxu1 %v6607_v50 }
 0x21d   :  { %v7939_v50 = vsub.s32 0, %v7936_v49 }
 0x21f   :  { %2430 = vmatpush1.bf16.msra.mxu1 %v6605_v51  ;;  %v1085_v51 = vld [vmem:[%s9016_s6] ss:$2 sm:$0x3] }
 0x220   :  { %2431 = vmatprep.subr.bf16.mxu1 %v6613_v52  ;;  %v7945_v52 = vsub.s32 1, %v7936_v49 }
 0x223   :  { %2432 = vmatpush1.bf16.msra.mxu1 %v6611_v53  ;;  %v5507_v53 = vld [vmem:[%s9016_s6 + $0x1] ss:$2 sm:$0x3] }
 0x224   :  { %2433 = vmatprep.subr.bf16.mxu1 %v6619_v54  ;;  %v1092_v54 = vrot.slane %v1085_v51, %v7939_v50 }
 0x227   :  { %2434 = vmatpush1.bf16.msra.mxu1 %v6617_v55  ;;  %v1096_v55 = vrot.slane %v1085_v51, %v7945_v52  ;;  %v6799_v51 = vld [vmem:[%s9017_s7 + $0x4ac] ss:$16 sps:$4 sm:$0xff]  }
 0x228   :  { %2435 = vmatprep.subr.bf16.mxu1 %v6625_v56  ;;  %v1111_v56 = vrot.slane %v5507_v53, %v7939_v50 }
 0x22b   :  { %2436 = vmatpush1.bf16.msra.mxu1 %v6623_v57 }
 0x22c   :  { %2437 = vmatprep.subr.bf16.mxu1 %v6631_v58  ;;  %v1115_v58 = vrot.slane %v5507_v53, %v7945_v52  ;;  %v6794_v53 = vld [vmem:[%s9017_s7 + $0x4a0] ss:$16 sps:$4 sm:$0xff]  }
 0x22f   :  { %2438 = vmatpush1.bf16.msra.mxu1 %v6629_v59 }
 0x230   :  { %2439 = vmatprep.subr.bf16.mxu1 %v6637_v60 }
 0x233   :  { %2440 = vmatpush1.bf16.msra.mxu1 %v6635_v61 }
 0x234   :  { %2441 = vmatprep.subr.bf16.mxu1 %v6643_v62 }
 0x237   :  { %2442 = vmatpush1.bf16.msra.mxu1 %v6641_v41 }
 0x238   :  { %2443 = vmatprep.subr.bf16.mxu1 %v6649_v63 }
 0x23b   :  { %2444 = vmatpush1.bf16.msra.mxu1 %v6647_v0 }
 0x23c   :  { %2445 = vmatprep.subr.bf16.mxu1 %v6655_v1 }
 0x23f   :  { %2446 = vmatpush1.bf16.msra.mxu1 %v6653_v2 }
 0x240   :  { %2447 = vmatprep.subr.bf16.mxu1 %v6661_v42 }
 0x243   :  { %2448 = vmatpush1.bf16.msra.mxu1 %v6659_v3 }
 0x244   :  { %2449 = vmatprep.subr.bf16.mxu1 %v6667_v5 }
 0x247   :  { %2450 = vmatpush1.bf16.msra.mxu1 %v6665_v6 }
 0x248   :  { %2462 = vmatprep.subr.bf16.mxu1 %v6673_v7 }
 0x24a   :  { %2452 = vmatmul.mubr.bf16.vlgmr.msra.gmra.mrb[24].mxu1 %v7140_v11  ;;  %v6691_v11 = vld [vmem:[%s9017_s7 + $0x26c] ss:$16 sps:$4 sm:$0xff]  }
 0x24b   :  { %2463 = vmatpush1.bf16.msra.mxu1 %v6671_v8 }
 0x24c   :  { %2464 = vmatprep.subr.bf16.mxu1 %v6679_v10 }
 0x24f   :  { %2465 = vmatpush1.bf16.msra.mxu1 %v6677_v12 }
 0x250   :  { %2466 = vmatprep.subr.bf16.mxu1 %v6685_v13 }
 0x253   :  { %2467 = vmatpush1.bf16.msra.mxu1 %v6683_v14 }
 0x254   :  { %2468 = vmatprep.subr.bf16.mxu1 %v6691_v11 }
 0x257   :  { %2469 = vmatpush1.bf16.msra.mxu1 %v6689_v15 }
 0x258   :  { %2470 = vmatprep.subr.bf16.mxu1 %v6697_v16 }
 0x25b   :  { %2471 = vmatpush1.bf16.msra.mxu1 %v6695_v17  ;;  %v6764_v17 = vld [vmem:[%s9017_s7 + $0x400] ss:$16 sps:$4 sm:$0xff]  }
 0x25c   :  { %2472 = vmatprep.subr.bf16.mxu1 %v6703_v18  ;;  %v6767_v18 = vld [vmem:[%s9017_s7 + $0x408] ss:$16 sps:$4 sm:$0xff]  }
 0x25f   :  { %2473 = vmatpush1.bf16.msra.mxu1 %v6701_v19 }
 0x260   :  { %2474 = vmatprep.subr.bf16.mxu1 %v6709_v21 }
 0x263   :  { %2475 = vmatpush1.bf16.msra.mxu1 %v6707_v23  ;;  %v6775_v23 = vld [vmem:[%s9017_s7 + $0x42c] ss:$16 sps:$4 sm:$0xff]  }
 0x264   :  { %2476 = vmatprep.subr.bf16.mxu1 %v6715_v4 }
 0x267   :  { %2477 = vmatpush1.bf16.msra.mxu1 %v6713_v26 }
 0x268   :  { %2478 = vmatprep.subr.bf16.mxu1 %v6721_v28  ;;  %v6773_v28 = vld [vmem:[%s9017_s7 + $0x428] ss:$16 sps:$4 sm:$0xff]  }
 0x26b   :  { %2479 = vmatpush1.bf16.msra.mxu1 %v6719_v29 }
 0x26c   :  { %2480 = vmatprep.subr.bf16.mxu1 %v6727_v31  ;;  %v6781_v31 = vld [vmem:[%s9017_s7 + $0x44c] ss:$16 sps:$4 sm:$0xff]  }
 0x26f   :  { %2481 = vmatpush1.bf16.msra.mxu1 %v6725_v32 }
 0x270   :  { %2482 = vmatprep.subr.bf16.mxu1 %v6733_v33 }
 0x273   :  { %2483 = vmatpush1.bf16.msra.mxu1 %v6731_v34 }
 0x274   :  { %2484 = vmatprep.subr.bf16.mxu1 %v6739_v35  ;;  %v6776_v35 = vld [vmem:[%s9017_s7 + $0x440] ss:$16 sps:$4 sm:$0xff]  }
 0x277   :  { %2485 = vmatpush1.bf16.msra.mxu1 %v6737_v36 }
 0x278   :  { %2486 = vmatprep.subr.bf16.mxu1 %v6745_v37  ;;  %v6779_v37 = vld [vmem:[%s9017_s7 + $0x448] ss:$16 sps:$4 sm:$0xff]  }
 0x27b   :  { %2487 = vmatpush1.bf16.msra.mxu1 %v6743_v38  ;;  %v6784_v38 = vld [vmem:[%s9017_s7 + $0x464] ss:$16 sps:$4 sm:$0xff]  }
 0x27c   :  { %2488 = vmatprep.subr.bf16.mxu1 %v6751_v39  ;;  %v6787_v39 = vld [vmem:[%s9017_s7 + $0x46c] ss:$16 sps:$4 sm:$0xff]  }
 0x27f   :  { %2489 = vmatpush1.bf16.msra.mxu1 %v6749_v40  ;;  %v6782_v40 = vld [vmem:[%s9017_s7 + $0x460] ss:$16 sps:$4 sm:$0xff]  }
 0x280   :  { %2490 = vmatprep.subr.bf16.mxu1 %v6757_v43  ;;  %v6785_v43 = vld [vmem:[%s9017_s7 + $0x468] ss:$16 sps:$4 sm:$0xff]  }
 0x283   :  { %2491 = vmatpush1.bf16.msra.mxu1 %v6755_v44  ;;  %v6790_v44 = vld [vmem:[%s9017_s7 + $0x484] ss:$16 sps:$4 sm:$0xff]  }
 0x284   :  { %2492 = vmatprep.subr.bf16.mxu1 %v6763_v45  ;;  %v6793_v45 = vld [vmem:[%s9017_s7 + $0x48c] ss:$16 sps:$4 sm:$0xff]  }
 0x287   :  { %2493 = vmatpush1.bf16.msra.mxu1 %v6761_v46  ;;  %v6788_v46 = vld [vmem:[%s9017_s7 + $0x480] ss:$16 sps:$4 sm:$0xff]  }
 0x288   :  { %2505 = vmatprep.subr.bf16.mxu1 %v6769_v47  ;;  %v6791_v47 = vld [vmem:[%s9017_s7 + $0x488] ss:$16 sps:$4 sm:$0xff]  }
 0x2dd   :  { %v1066_v57 = vpop.f32.mrb[16].mxu1 }
 0x2de   :  { %v1099_v59 = vmul.f32 %v1092_v54, %v1066_v57  ;;  %v1068_v60 = vpop.f32.mrb[17].mxu1  ;;  %v6800_v57 = vld [vmem:[%s9017_s7 + $0x4c0] ss:$16 sps:$4 sm:$0xff]  }
 0x2df   :  { %v1100_v61 = vmul.f32 %v1096_v55, %v1068_v60  ;;  %v1070_v62 = vpop.f32.mrb[18].mxu1  ;;  %v6811_v60 = vld [vmem:[%s9017_s7 + $0x4ec] ss:$16 sps:$4 sm:$0xff]  }
 0x2e0   :  { %v1118_v41 = vadd.f32 %v1111_v56, %v1099_v59  ;;  %v1101_v63 = vmul.f32 %v1092_v54, %v1070_v62  ;;  %v1072_v0 = vpop.f32.mrb[19].mxu1  ;;  %v6808_v59 = vld [vmem:[%s9017_s7 + $0x4e4] ss:$16 sps:$4 sm:$0xff]   ;;  %v6809_v62 = vld [vmem:[%s9017_s7 + $0x4e8] ss:$16 sps:$4 sm:$0xff]  }
 0x2e1   :  { %v1119_v1 = vadd.f32 %v1115_v58, %v1100_v61  ;;  %v1102_v2 = vmul.f32 %v1096_v55, %v1072_v0  ;;  %v6806_v61 = vld [vmem:[%s9017_s7 + $0x4e0] ss:$16 sps:$4 sm:$0xff]  }
 0x2e2   :  { %v1120_v42 = vadd.f32 %v1111_v56, %v1101_v63  ;;  %v1126_v5 = vmax.f32 %v1118_v41, 0.0  ;;  %v6814_v41 = vld [vmem:[%s9017_s7 + $0x504] ss:$16 sps:$4 sm:$0xff]   ;;  %v6817_v63 = vld [vmem:[%s9017_s7 + $0x50c] ss:$16 sps:$4 sm:$0xff]  }
 0x2e3   :  { %v1121_v3 = vadd.f32 %v1115_v58, %v1102_v2  ;;  %v1127_v7 = vmax.f32 %v1119_v1, 0.0  ;;  %v6812_v0 = vld [vmem:[%s9017_s7 + $0x500] ss:$16 sps:$4 sm:$0xff]   ;;  %v6815_v1 = vld [vmem:[%s9017_s7 + $0x508] ss:$16 sps:$4 sm:$0xff]  }
 0x2e4   :  { %v1128_v6 = vmax.f32 %v1120_v42, 0.0  ;;  %v6820_v2 = vld [vmem:[%s9017_s7 + $0x524] ss:$16 sps:$4 sm:$0xff]   ;;  %v6823_v42 = vld [vmem:[%s9017_s7 + $0x52c] ss:$16 sps:$4 sm:$0xff]  }
 0x2e5   :  { %v1129_v8 = vmax.f32 %v1121_v3, 0.0  ;;  %v1076_v10 = vpop.f32.mrb[20].mxu1  ;;  %v6818_v3 = vld [vmem:[%s9017_s7 + $0x520] ss:$16 sps:$4 sm:$0xff]  }
 0x2e6   :  { %v1134_v12 = vpack.c.bf16 %v1128_v6, %v1126_v5  ;;  %v1103_v13 = vmul.f32 %v1092_v54, %v1076_v10  ;;  %v1078_v14 = vpop.f32.mrb[21].mxu1  ;;  %v6821_v5 = vld [vmem:[%s9017_s7 + $0x528] ss:$16 sps:$4 sm:$0xff]   ;;  %v6826_v6 = vld [vmem:[%s9017_s7 + $0x544] ss:$16 sps:$4 sm:$0xff]  }
 0x2e7   :  { %v1104_v11 = vmul.f32 %v1096_v55, %v1078_v14  ;;  %v1080_v15 = vpop.f32.mrb[22].mxu1  ;;  %v1135_v16 = vpack.c.bf16 %v1129_v8, %v1127_v7  ;;  %v6829_v7 = vld [vmem:[%s9017_s7 + $0x54c] ss:$16 sps:$4 sm:$0xff]   ;;  %v6824_v8 = vld [vmem:[%s9017_s7 + $0x540] ss:$16 sps:$4 sm:$0xff]  }
 0x2e8   :  { %v1122_v19 = vadd.f32 %v1111_v56, %v1103_v13  ;;  %v1105_v20 = vmul.f32 %v1092_v54, %v1080_v15  ;;  %v1082_v21 = vpop.f32.mrb[23].mxu1  ;;  %v6797_v54 = vld [vmem:[%s9017_s7 + $0x4a8] ss:$16 sps:$4 sm:$0xff]   ;;  %v6835_v13 = vld [vmem:[%s9017_s7 + $0x56c] ss:$16 sps:$4 sm:$0xff]  }
 0x2e9   :  { %v1123_v24 = vadd.f32 %v1115_v58, %v1104_v11  ;;  %v1106_v4 = vmul.f32 %v1096_v55, %v1082_v21  ;;  %2365 = vmatprep.mubr.bf16.mxu0 %v1135_v16  ;;  %2494 = vmatprep.mubr.bf16.mxu1 %v1135_v16  ;;  %v6802_v55 = vld [vmem:[%s9017_s7 + $0x4c4] ss:$16 sps:$4 sm:$0xff]   ;;  %v6827_v10 = vld [vmem:[%s9017_s7 + $0x548] ss:$16 sps:$4 sm:$0xff]   ;;  %v6830_v14 = vld [vmem:[%s9017_s7 + $0x560] ss:$16 sps:$4 sm:$0xff]  }
 0x2ea   :  { %v1124_v25 = vadd.f32 %v1111_v56, %v1105_v20  ;;  %2366 = vmatmul.mubr.bf16.vlgmr.msra.gmra.mrb[24].mxu0 %v1134_v12  ;;  %2495 = vmatmul.mubr.bf16.vlgmr.msra.gmra.mrb[24].mxu1 %v1134_v12  ;;  %v1130_v9 = vmax.f32 %v1122_v19, 0.0  ;;  %v6805_v56 = vld [vmem:[%s9017_s7 + $0x4cc] ss:$16 sps:$4 sm:$0xff]   ;;  %v6832_v12 = vld [vmem:[%s9017_s7 + $0x564] ss:$16 sps:$4 sm:$0xff]  }
 0x2eb   :  { %v1125_v26 = vadd.f32 %v1115_v58, %v1106_v4  ;;  %2377 = vmatpush1.bf16.msra.mxu0 %v6764_v17  ;;  %2506 = vmatpush1.bf16.msra.mxu1 %v6767_v18  ;;  %v1131_v32 = vmax.f32 %v1123_v24, 0.0  ;;  %v6803_v58 = vld [vmem:[%s9017_s7 + $0x4c8] ss:$16 sps:$4 sm:$0xff]   ;;  %v6838_v15 = vld [vmem:[%s9017_s7 + $0x584] ss:$16 sps:$4 sm:$0xff]  }
 0x2ec   :  { %v1132_v29 = vmax.f32 %v1124_v25, 0.0  ;;  %2378 = vmatprep.subr.bf16.mxu0 %v6772_v22  ;;  %2507 = vmatprep.subr.bf16.mxu1 %v6775_v23  ;;  %v6833_v11 = vld [vmem:[%s9017_s7 + $0x568] ss:$16 sps:$4 sm:$0xff]   ;;  %v6841_v16 = vld [vmem:[%s9017_s7 + $0x58c] ss:$16 sps:$4 sm:$0xff]  }
 0x2ed   :  { %v1133_v33 = vmax.f32 %v1125_v26, 0.0  ;;  %v6836_v17 = vld [vmem:[%s9017_s7 + $0x580] ss:$16 sps:$4 sm:$0xff]   ;;  %v6839_v18 = vld [vmem:[%s9017_s7 + $0x588] ss:$16 sps:$4 sm:$0xff]  }
 0x2ee   :  { %v7978_v34 = vpack.c.bf16 %v1132_v29, %v1130_v9  ;;  %v6844_v19 = vld [vmem:[%s9017_s7 + $0x5a4] ss:$16 sps:$4 sm:$0xff]   ;;  %v6847_v20 = vld [vmem:[%s9017_s7 + $0x5ac] ss:$16 sps:$4 sm:$0xff]   ;;  %v6842_v21 = vld [vmem:[%s9017_s7 + $0x5a0] ss:$16 sps:$4 sm:$0xff]  }
 0x2ef   :  { %2379 = vmatpush1.bf16.msra.mxu0 %v6770_v27  ;;  %2508 = vmatpush1.bf16.msra.mxu1 %v6773_v28  ;;  %v1137_v36 = vpack.c.bf16 %v1133_v33, %v1131_v32  ;;  %v6845_v22 = vld [vmem:[%s9017_s7 + $0x5a8] ss:$16 sps:$4 sm:$0xff]   ;;  %v6850_v23 = vld [vmem:[%s9017_s7 + $0x5c4] ss:$16 sps:$4 sm:$0xff]   ;;  %v6853_v24 = vld [vmem:[%s9017_s7 + $0x5cc] ss:$16 sps:$4 sm:$0xff]  }
 0x2f0   :  { %2380 = vmatprep.subr.bf16.mxu0 %v6778_v30  ;;  %2509 = vmatprep.subr.bf16.mxu1 %v6781_v31  ;;  %v6848_v4 = vld [vmem:[%s9017_s7 + $0x5c0] ss:$16 sps:$4 sm:$0xff]   ;;  %v6851_v25 = vld [vmem:[%s9017_s7 + $0x5c8] ss:$16 sps:$4 sm:$0xff]   ;;  %v6856_v26 = vld [vmem:[%s9017_s7 + $0x5e4] ss:$16 sps:$4 sm:$0xff]  }
 0x2f1   :  { %2408 = vmatprep.mubr.bf16.mxu0 %v1137_v36  ;;  %2537 = vmatprep.mubr.bf16.mxu1 %v1137_v36  ;;  %v6859_v27 = vld [vmem:[%s9017_s7 + $0x5ec] ss:$16 sps:$4 sm:$0xff]   ;;  %v6854_v28 = vld [vmem:[%s9017_s7 + $0x5e0] ss:$16 sps:$4 sm:$0xff]   ;;  %v6857_v9 = vld [vmem:[%s9017_s7 + $0x5e8] ss:$16 sps:$4 sm:$0xff]  }
 0x2f2   :  { %v6860_v29 = vld [vmem:[%s9019_s9 + $0x40] sm:$0xff]   ;;  %v6864_v33 = vld [vmem:[%s9019_s9 + $0x48] sm:$0xff]  }
 0x2f3   :  { %2381 = vmatpush1.bf16.msra.mxu0 %v6776_v35  ;;  %2510 = vmatpush1.bf16.msra.mxu1 %v6779_v37  ;;  %v6862_v30 = vld [vmem:[%s9019_s9 + $0x1c0] sm:$0xff]   ;;  %v6866_v35 = vld [vmem:[%s9019_s9 + $0x1c8] sm:$0xff]  }
 0x2f4   :  { %2382 = vmatprep.subr.bf16.mxu0 %v6784_v38  ;;  %2511 = vmatprep.subr.bf16.mxu1 %v6787_v39  ;;  %v6861_v31 = vld [vmem:[%s9019_s9] sm:$0xff]   ;;  %v6865_v36 = vld [vmem:[%s9019_s9 + $0x8] sm:$0xff]   ;;  %v6868_v38 = vld [vmem:[%s9019_s9 + $0x50] sm:$0xff]  }
 0x2f5   :  { %v6863_v32 = vld [vmem:[%s9019_s9 + $0x180] sm:$0xff]   ;;  %v6867_v37 = vld [vmem:[%s9019_s9 + $0x188] sm:$0xff]   ;;  %v6869_v39 = vld [vmem:[%s9019_s9 + $0x10] sm:$0xff]  }
 0x2f7   :  { %2383 = vmatpush1.bf16.msra.mxu0 %v6782_v40  ;;  %2512 = vmatpush1.bf16.msra.mxu1 %v6785_v43  ;;  %v6871_v40 = vld [vmem:[%s9019_s9 + $0x190] sm:$0xff]   ;;  %v6872_v43 = vld [vmem:[%s9019_s9 + $0x58] sm:$0xff]  }
 0x2f8   :  { %2384 = vmatprep.subr.bf16.mxu0 %v6790_v44  ;;  %2513 = vmatprep.subr.bf16.mxu1 %v6793_v45  ;;  %v6874_v44 = vld [vmem:[%s9019_s9 + $0x1d8] sm:$0xff]  }
 0x2f9   :  { %v6873_v45 = vld [vmem:[%s9019_s9 + $0x18] sm:$0xff]  }
 0x2fb   :  { %2385 = vmatpush1.bf16.msra.mxu0 %v6788_v46  ;;  %2514 = vmatpush1.bf16.msra.mxu1 %v6791_v47  ;;  %v6875_v46 = vld [vmem:[%s9019_s9 + $0x198] sm:$0xff]   ;;  %v6876_v47 = vld [vmem:[%s9019_s9 + $0x60] sm:$0xff]  }
 0x2fc   :  { %2386 = vmatprep.subr.bf16.mxu0 %v6796_v48  ;;  %2515 = vmatprep.subr.bf16.mxu1 %v6799_v51  ;;  %v6878_v48 = vld [vmem:[%s9019_s9 + $0x1e0] sm:$0xff]  }
 0x2fd   :  { %v6877_v51 = vld [vmem:[%s9019_s9 + $0x20] sm:$0xff]  }
 0x2ff   :  { %2387 = vmatpush1.bf16.msra.mxu0 %v6794_v53  ;;  %2516 = vmatpush1.bf16.msra.mxu1 %v6797_v54  ;;  %v6879_v53 = vld [vmem:[%s9019_s9 + $0x1a0] sm:$0xff]   ;;  %v6880_v54 = vld [vmem:[%s9019_s9 + $0x68] sm:$0xff]  }
 0x300   :  { %2388 = vmatprep.subr.bf16.mxu0 %v6802_v55  ;;  %2517 = vmatprep.subr.bf16.mxu1 %v6805_v56  ;;  %v6881_v55 = vld [vmem:[%s9019_s9 + $0x28] sm:$0xff]  }
 0x301   :  { %v6882_v56 = vld [vmem:[%s9019_s9 + $0x1e8] sm:$0xff]  }
 0x303   :  { %2389 = vmatpush1.bf16.msra.mxu0 %v6800_v57  ;;  %2518 = vmatpush1.bf16.msra.mxu1 %v6803_v58  ;;  %v6883_v57 = vld [vmem:[%s9019_s9 + $0x1a8] sm:$0xff]   ;;  %v6884_v58 = vld [vmem:[%s9019_s9 + $0x70] sm:$0xff]  }
 0x304   :  { %2390 = vmatprep.subr.bf16.mxu0 %v6808_v59  ;;  %2519 = vmatprep.subr.bf16.mxu1 %v6811_v60  ;;  %v6885_v59 = vld [vmem:[%s9019_s9 + $0x30] sm:$0xff]  }
 0x305   :  { %v6886_v60 = vld [vmem:[%s9019_s9 + $0x1f0] sm:$0xff]  }
 0x307   :  { %2391 = vmatpush1.bf16.msra.mxu0 %v6806_v61  ;;  %2520 = vmatpush1.bf16.msra.mxu1 %v6809_v62  ;;  %v6887_v61 = vld [vmem:[%s9019_s9 + $0x1b0] sm:$0xff]   ;;  %v6888_v62 = vld [vmem:[%s9019_s9 + $0x78] sm:$0xff]  }
 0x308   :  { %2392 = vmatprep.subr.bf16.mxu0 %v6814_v41  ;;  %2521 = vmatprep.subr.bf16.mxu1 %v6817_v63  ;;  %v6889_v41 = vld [vmem:[%s9019_s9 + $0x38] sm:$0xff]  }
 0x309   :  { %v6890_v63 = vld [vmem:[%s9019_s9 + $0x1f8] sm:$0xff]  }
 0x30b   :  { %2393 = vmatpush1.bf16.msra.mxu0 %v6812_v0  ;;  %2522 = vmatpush1.bf16.msra.mxu1 %v6815_v1  ;;  %v6891_v0 = vld [vmem:[%s9019_s9 + $0x1b8] sm:$0xff]   ;;  %v6892_v1 = vld [vmem:[%s9019_s9 + $0xc0] sm:$0xff]  }
 0x30c   :  { %2394 = vmatprep.subr.bf16.mxu0 %v6820_v2  ;;  %2523 = vmatprep.subr.bf16.mxu1 %v6823_v42  ;;  %v6894_v2 = vld [vmem:[%s9019_s9 + $0x2c0] sm:$0xff]   ;;  %v2562_v42 = vsub.s32 2, %v7936_v49 }
 0x30f   :  { %2395 = vmatpush1.bf16.msra.mxu0 %v6818_v3  ;;  %2524 = vmatpush1.bf16.msra.mxu1 %v6821_v5  ;;  %v2548_v3 = vld [vmem:[%s9018_s8] ss:$2 sm:$0xf]  ;;  %v2566_v5 = vsub.s32 3, %v7936_v49 }
 0x310   :  { %2396 = vmatprep.subr.bf16.mxu0 %v6826_v6  ;;  %2525 = vmatprep.subr.bf16.mxu1 %v6829_v7  ;;  %v5700_v6 = vld [vmem:[%s9018_s8 + $0x1] ss:$2 sm:$0xf]  ;;  %v2555_v7 = vrot.slane %v2548_v3, %v7939_v50 }
 0x313   :  { %2397 = vmatpush1.bf16.msra.mxu0 %v6824_v8  ;;  %2526 = vmatpush1.bf16.msra.mxu1 %v6827_v10  ;;  %v2563_v8 = vrot.slane %v2548_v3, %v2562_v42  ;;  %v2559_v10 = vrot.slane %v2548_v3, %v7945_v52 }
 0x314   :  { %2398 = vmatprep.subr.bf16.mxu0 %v6832_v12  ;;  %2527 = vmatprep.subr.bf16.mxu1 %v6835_v13  ;;  %v2567_v12 = vrot.slane %v2548_v3, %v2566_v5  ;;  %v2584_v13 = vrot.slane %v5700_v6, %v7939_v50  ;;  %v6910_v3 = vld [vmem:[%s9019_s9 + $0x2e0] sm:$0xff]  }
 0x317   :  { %2399 = vmatpush1.bf16.msra.mxu0 %v6830_v14  ;;  %2528 = vmatpush1.bf16.msra.mxu1 %v6833_v11  ;;  %v2592_v14 = vrot.slane %v5700_v6, %v2562_v42  ;;  %v6909_v42 = vld [vmem:[%s9019_s9 + $0xa0] sm:$0xff]  }
 0x318   :  { %2400 = vmatprep.subr.bf16.mxu0 %v6838_v15  ;;  %2529 = vmatprep.subr.bf16.mxu1 %v6841_v16  ;;  %v2588_v16 = vrot.slane %v5700_v6, %v7945_v52 }
 0x31b   :  { %2401 = vmatpush1.bf16.msra.mxu0 %v6836_v17  ;;  %2530 = vmatpush1.bf16.msra.mxu1 %v6839_v18  ;;  %v2596_v17 = vrot.slane %v5700_v6, %v2566_v5  ;;  %v6912_v5 = vld [vmem:[%s9019_s9 + $0xe8] sm:$0xff]   ;;  %v6911_v6 = vld [vmem:[%s9019_s9 + $0x2a0] sm:$0xff]  }
 0x31c   :  { %2402 = vmatprep.subr.bf16.mxu0 %v6844_v19  ;;  %2531 = vmatprep.subr.bf16.mxu1 %v6847_v20 }
 0x31f   :  { %2403 = vmatpush1.bf16.msra.mxu0 %v6842_v21  ;;  %2532 = vmatpush1.bf16.msra.mxu1 %v6845_v22 }
 0x320   :  { %2404 = vmatprep.subr.bf16.mxu0 %v6850_v23  ;;  %2533 = vmatprep.subr.bf16.mxu1 %v6853_v24 }
 0x323   :  { %2405 = vmatpush1.bf16.msra.mxu0 %v6848_v4  ;;  %2534 = vmatpush1.bf16.msra.mxu1 %v6851_v25 }
 0x324   :  { %2406 = vmatprep.subr.bf16.mxu0 %v6856_v26  ;;  %2535 = vmatprep.subr.bf16.mxu1 %v6859_v27 }
 0x327   :  { %2407 = vmatpush1.bf16.msra.mxu0 %v6854_v28  ;;  %2536 = vmatpush1.bf16.msra.mxu1 %v6857_v9 }
 0x328   :  { %6026 = vmatprep.subr.bf16.mxu0 %v6860_v29  ;;  %6092 = vmatprep.subr.bf16.mxu1 %v6862_v30 }
 0x32a   :  { %2409 = vmatmul.mubr.bf16.vlgmr.msra.gmra.mrb[24].mxu0 %v7978_v34  ;;  %2538 = vmatmul.mubr.bf16.vlgmr.msra.gmra.mrb[24].mxu1 %v7978_v34  ;;  %v6870_v34 = vld [vmem:[%s9019_s9 + $0x1d0] sm:$0xff]  }
 0x32b   :  { %6027 = vmatpush3.bf16.msra.mxu0 %v6861_v31  ;;  %6093 = vmatpush3.bf16.msra.mxu1 %v6863_v32 }
 0x32c   :  { %6028 = vmatprep.subr.bf16.mxu0 %v6864_v33  ;;  %6094 = vmatprep.subr.bf16.mxu1 %v6866_v35 }
 0x32f   :  { %6029 = vmatpush3.bf16.msra.mxu0 %v6865_v36  ;;  %6095 = vmatpush3.bf16.msra.mxu1 %v6867_v37 }
 0x330   :  { %6030 = vmatprep.subr.bf16.mxu0 %v6868_v38  ;;  %6096 = vmatprep.subr.bf16.mxu1 %v6870_v34 }
 0x333   :  { %6031 = vmatpush3.bf16.msra.mxu0 %v6869_v39  ;;  %6097 = vmatpush3.bf16.msra.mxu1 %v6871_v40  ;;  %v6893_v40 = vld [vmem:[%s9019_s9 + $0x80] sm:$0xff]  }
 0x334   :  { %6032 = vmatprep.subr.bf16.mxu0 %v6872_v43  ;;  %6098 = vmatprep.subr.bf16.mxu1 %v6874_v44 }
 0x337   :  { %6033 = vmatpush3.bf16.msra.mxu0 %v6873_v45  ;;  %6099 = vmatpush3.bf16.msra.mxu1 %v6875_v46  ;;  %v6896_v46 = vld [vmem:[%s9019_s9 + $0xc8] sm:$0xff]  }
 0x338   :  { %6034 = vmatprep.subr.bf16.mxu0 %v6876_v47  ;;  %6100 = vmatprep.subr.bf16.mxu1 %v6878_v48 }
 0x33b   :  { %6035 = vmatpush3.bf16.msra.mxu0 %v6877_v51  ;;  %6101 = vmatpush3.bf16.msra.mxu1 %v6879_v53  ;;  %v6895_v53 = vld [vmem:[%s9019_s9 + $0x280] sm:$0xff]  }
 0x33c   :  { %6036 = vmatprep.subr.bf16.mxu0 %v6880_v54  ;;  %6102 = vmatprep.subr.bf16.mxu1 %v6882_v56  ;;  %v6898_v56 = vld [vmem:[%s9019_s9 + $0x2c8] sm:$0xff]  }
 0x33f   :  { %6037 = vmatpush3.bf16.msra.mxu0 %v6881_v55  ;;  %6103 = vmatpush3.bf16.msra.mxu1 %v6883_v57  ;;  %v6897_v55 = vld [vmem:[%s9019_s9 + $0x88] sm:$0xff]  }
 0x340   :  { %6038 = vmatprep.subr.bf16.mxu0 %v6884_v58  ;;  %6104 = vmatprep.subr.bf16.mxu1 %v6886_v60  ;;  %v6900_v58 = vld [vmem:[%s9019_s9 + $0xd0] sm:$0xff]  }
 0x341   :  { %v6901_v60 = vld [vmem:[%s9019_s9 + $0x90] sm:$0xff]  }
 0x343   :  { %6039 = vmatpush3.bf16.msra.mxu0 %v6885_v59  ;;  %6105 = vmatpush3.bf16.msra.mxu1 %v6887_v61  ;;  %v6899_v59 = vld [vmem:[%s9019_s9 + $0x288] sm:$0xff]   ;;  %v6902_v61 = vld [vmem:[%s9019_s9 + $0x2d0] sm:$0xff]  }
 0x344   :  { %6040 = vmatprep.subr.bf16.mxu0 %v6888_v62  ;;  %6106 = vmatprep.subr.bf16.mxu1 %v6890_v63  ;;  %v6904_v62 = vld [vmem:[%s9019_s9 + $0xd8] sm:$0xff]  }
 0x345   :  { %v6905_v63 = vld [vmem:[%s9019_s9 + $0x98] sm:$0xff]  }
 0x347   :  { %6041 = vmatpush3.bf16.msra.mxu0 %v6889_v41  ;;  %6107 = vmatpush3.bf16.msra.mxu1 %v6891_v0  ;;  %v6903_v41 = vld [vmem:[%s9019_s9 + $0x290] sm:$0xff]   ;;  %v6906_v0 = vld [vmem:[%s9019_s9 + $0x2d8] sm:$0xff]  }
 0x348   :  { %6048 = vmatprep.subr.bf16.mxu0 %v6892_v1  ;;  %6136 = vmatprep.subr.bf16.mxu1 %v6894_v2  ;;  %v6908_v1 = vld [vmem:[%s9019_s9 + $0xe0] sm:$0xff]   ;;  %v6907_v2 = vld [vmem:[%s9019_s9 + $0x298] sm:$0xff]  }
 0x3fd   :  { %v2410_v11 = vpop.f32.mrb[24].mxu0  ;;  %v2539_v15 = vpop.f32.mrb[24].mxu1 }
 0x3fe   :  { %v2572_v18 = vmul.f32 %v2555_v7, %v2410_v11  ;;  %v2574_v49 = vmul.f32 %v2563_v8, %v2539_v15  ;;  %v2412_v19 = vpop.f32.mrb[25].mxu0  ;;  %v2541_v20 = vpop.f32.mrb[25].mxu1  ;;  %v6920_v11 = vld [vmem:[%s9019_s9 + $0xf8] sm:$0xff]   ;;  %v6919_v15 = vld [vmem:[%s9019_s9 + $0x2b0] sm:$0xff]  }
 0x3ff   :  { %v2573_v21 = vmul.f32 %v2559_v10, %v2412_v19  ;;  %v2575_v22 = vmul.f32 %v2567_v12, %v2541_v20  ;;  %v2414_v23 = vpop.f32.mrb[26].mxu0  ;;  %v2543_v24 = vpop.f32.mrb[26].mxu1  ;;  %v6923_v19 = vld [vmem:[%s9019_s9 + $0x2b8] sm:$0xff]   ;;  %v6925_v20 = vld [vmem:[%s9019_s9 + $0x100] sm:$0xff]  }
 0x400   :  { %v2601_v4 = vadd.f32 %v2584_v13, %v2572_v18  ;;  %v2603_v25 = vadd.f32 %v2592_v14, %v2574_v49  ;;  %v2576_v26 = vmul.f32 %v2555_v7, %v2414_v23  ;;  %v2578_v27 = vmul.f32 %v2563_v8, %v2543_v24  ;;  %v2416_v28 = vpop.f32.mrb[27].mxu0  ;;  %v2545_v50 = vpop.f32.mrb[27].mxu1  ;;  %v6913_v7 = vld [vmem:[%s9019_s9 + $0xa8] sm:$0xff]   ;;  %v6924_v18 = vld [vmem:[%s9019_s9 + $0x140] sm:$0xff]  }
 0x401   :  { %v2602_v9 = vadd.f32 %v2588_v16, %v2573_v21  ;;  %v2604_v29 = vadd.f32 %v2596_v17, %v2575_v22  ;;  %v2577_v30 = vmul.f32 %v2559_v10, %v2416_v28  ;;  %v2579_v31 = vmul.f32 %v2567_v12, %v2545_v50  ;;  %v6914_v8 = vld [vmem:[%s9019_s9 + $0x2e8] sm:$0xff]   ;;  %v6916_v10 = vld [vmem:[%s9019_s9 + $0xf0] sm:$0xff]   ;;  %v6926_v23 = vld [vmem:[%s9019_s9 + $0x3c0] sm:$0xff]  }
 0x402   :  { %v8258_v52 = vmax.f32 %v2601_v4, 0.0  ;;  %v8260_v32 = vmax.f32 %v2603_v25, 0.0  ;;  %v8262_v33 = vadd.f32 %v2584_v13, %v2576_v26  ;;  %v8264_v35 = vadd.f32 %v2592_v14, %v2578_v27  ;;  %v6915_v12 = vld [vmem:[%s9019_s9 + $0x2a8] sm:$0xff]   ;;  %v6917_v13 = vld [vmem:[%s9019_s9 + $0xb0] sm:$0xff]   ;;  %v6927_v26 = vld [vmem:[%s9019_s9 + $0x380] sm:$0xff]  }
 0x403   :  { %v8266_v36 = vmax.f32 %v2602_v9, 0.0  ;;  %v8268_v37 = vmax.f32 %v2604_v29, 0.0  ;;  %v8270_v38 = vadd.f32 %v2588_v16, %v2577_v30  ;;  %v8272_v34 = vadd.f32 %v2596_v17, %v2579_v31  ;;  %v6918_v14 = vld [vmem:[%s9019_s9 + $0x2f0] sm:$0xff]   ;;  %v6921_v16 = vld [vmem:[%s9019_s9 + $0xb8] sm:$0xff]   ;;  %v6928_v4 = vld [vmem:[%s9019_s9 + $0x148] sm:$0xff]  }
 0x404   :  { %v2623_v43 = vrot.slane %v8260_v32, 2  ;;  %v2673_v44 = vpack.c.bf16 %v8258_v52, %v8258_v52  ;;  %v6922_v17 = vld [vmem:[%s9019_s9 + $0x2f8] sm:$0xff]   ;;  %v2631_v21 = vrot.slane %v8260_v32, 4  ;;  %v2675_v22 = vpack.c.bf16 %v8260_v32, %v8260_v32  ;;  %v6929_v28 = vld [vmem:[%s9019_s9 + $0x108] sm:$0xff]   ;;  %v6932_v29 = vld [vmem:[%s9019_s9 + $0x150] sm:$0xff]  }
 0x405   :  { %v2674_v39 = vpack.c.bf16 %v8266_v36, %v8266_v36  ;;  %v2624_v45 = vrot.slane %v8268_v37, 2  ;;  %v2632_v47 = vrot.slane %v8268_v37, 4  ;;  %v2676_v48 = vpack.c.bf16 %v8268_v37, %v8268_v37  ;;  %v6930_v50 = vld [vmem:[%s9019_s9 + $0x3c8] sm:$0xff]   ;;  %v6933_v31 = vld [vmem:[%s9019_s9 + $0x110] sm:$0xff]  }
 0x406   :  { %v2679_v54 = vpack.c.bf16 %v2623_v43, %v2623_v43  ;;  %v2622_v49 = vrot.slane %v8266_v36, 2  ;;  %v2640_v24 = vrot.slane %v8268_v37, 6  ;;  %v2683_v27 = vpack.c.bf16 %v2631_v21, %v2631_v21  ;;  %v6931_v30 = vld [vmem:[%s9019_s9 + $0x388] sm:$0xff]   ;;  %v6934_v37 = vld [vmem:[%s9019_s9 + $0x3d0] sm:$0xff]   ;;  %v6937_v43 = vld [vmem:[%s9019_s9 + $0x118] sm:$0xff]  }
 0x407   :  { %4792 = vmatprep.mubr.bf16.mxu0 %v2674_v39  ;;  %v2680_v51 = vpack.c.bf16 %v2624_v45, %v2624_v45  ;;  %v2684_v57 = vpack.c.bf16 %v2632_v47, %v2632_v47  ;;  %v6936_v39 = vld [vmem:[%s9019_s9 + $0x158] sm:$0xff]   ;;  %v6940_v45 = vld [vmem:[%s9019_s9 + $0x160] sm:$0xff]  }
 0x408   :  { %4793 = vmatmul.mubr.bf16.vlgmr.msra.gmra.mrb[28].mxu0 %v2673_v44  ;;  %v2678_v25 = vpack.c.bf16 %v2622_v49, %v2622_v49  ;;  %v2688_v9 = vpack.c.bf16 %v2640_v24, %v2640_v24  ;;  %v6938_v44 = vld [vmem:[%s9019_s9 + $0x3d8] sm:$0xff]   ;;  %v6941_v47 = vld [vmem:[%s9019_s9 + $0x120] sm:$0xff]   ;;  %v6967_v49 = vld [vmem:[%s9019_s9 + $0x490] sm:$0xff]  }
 0x409   :  { %6049 = vmatpush3.bf16.msra.mxu0 %v6893_v40  ;;  %4832 = vmatprep.mubr.bf16.mxu0 %v2676_v48  ;;  %v6935_v40 = vld [vmem:[%s9019_s9 + $0x390] sm:$0xff]   ;;  %v6942_v48 = vld [vmem:[%s9019_s9 + $0x3e0] sm:$0xff]  }
 0x40a   :  { %4912 = vmatprep.mubr.bf16.mxu1 %v2680_v51  ;;  %6050 = vmatprep.subr.bf16.mxu0 %v6896_v46  ;;  %v6939_v46 = vld [vmem:[%s9019_s9 + $0x398] sm:$0xff]   ;;  %v6944_v51 = vld [vmem:[%s9019_s9 + $0x168] sm:$0xff]   ;;  %v6972_v21 = vld [vmem:[%s9019_s9 + $0x260] sm:$0xff]  }
 0x40b   :  { %4913 = vmatmul.mubr.bf16.vlgmr.msra.gmra.mrb[28].mxu1 %v2679_v54  ;;  %v6945_v54 = vld [vmem:[%s9019_s9 + $0x128] sm:$0xff]   ;;  %v6974_v24 = vld [vmem:[%s9019_s9 + $0x4e0] sm:$0xff]  }
 0x40c   :  { %6137 = vmatpush3.bf16.msra.mxu1 %v6895_v53  ;;  %4992 = vmatprep.mubr.bf16.mxu1 %v2684_v57  ;;  %v6943_v53 = vld [vmem:[%s9019_s9 + $0x3a0] sm:$0xff]   ;;  %v6947_v57 = vld [vmem:[%s9019_s9 + $0x3a8] sm:$0xff]  }
 0x40d   :  { %6051 = vmatpush3.bf16.msra.mxu0 %v6897_v55  ;;  %6138 = vmatprep.subr.bf16.mxu1 %v6898_v56  ;;  %v6946_v55 = vld [vmem:[%s9019_s9 + $0x3e8] sm:$0xff]   ;;  %v6948_v56 = vld [vmem:[%s9019_s9 + $0x170] sm:$0xff]  }
 0x40e   :  { %6052 = vmatprep.subr.bf16.mxu0 %v6900_v58  ;;  %v6949_v58 = vld [vmem:[%s9019_s9 + $0x130] sm:$0xff]  }
 0x410   :  { %6139 = vmatpush3.bf16.msra.mxu1 %v6899_v59  ;;  %v6950_v59 = vld [vmem:[%s9019_s9 + $0x3f0] sm:$0xff]  }
 0x411   :  { %6053 = vmatpush3.bf16.msra.mxu0 %v6901_v60  ;;  %6140 = vmatprep.subr.bf16.mxu1 %v6902_v61  ;;  %v6952_v60 = vld [vmem:[%s9019_s9 + $0x178] sm:$0xff]   ;;  %v6951_v61 = vld [vmem:[%s9019_s9 + $0x3b0] sm:$0xff]  }
 0x412   :  { %6054 = vmatprep.subr.bf16.mxu0 %v6904_v62  ;;  %v6953_v62 = vld [vmem:[%s9019_s9 + $0x138] sm:$0xff]  }
 0x414   :  { %6141 = vmatpush3.bf16.msra.mxu1 %v6903_v41  ;;  %v6954_v41 = vld [vmem:[%s9019_s9 + $0x3f8] sm:$0xff]  }
 0x415   :  { %6055 = vmatpush3.bf16.msra.mxu0 %v6905_v63  ;;  %6142 = vmatprep.subr.bf16.mxu1 %v6906_v0  ;;  %v2621_v63 = vrot.slane %v8258_v52, 2  ;;  %v6956_v0 = vld [vmem:[%s9019_s9 + $0x240] sm:$0xff]  }
 0x416   :  { %6056 = vmatprep.subr.bf16.mxu0 %v6908_v1  ;;  %v2630_v1 = vrot.slane %v8266_v36, 4 }
 0x418   :  { %6143 = vmatpush3.bf16.msra.mxu1 %v6907_v2  ;;  %v6955_v2 = vld [vmem:[%s9019_s9 + $0x3b8] sm:$0xff]  }
 0x419   :  { %6057 = vmatpush3.bf16.msra.mxu0 %v6909_v42  ;;  %6144 = vmatprep.subr.bf16.mxu1 %v6910_v3  ;;  %v6957_v42 = vld [vmem:[%s9019_s9 + $0x200] sm:$0xff]   ;;  %v2639_v3 = vrot.slane %v8260_v32, 6 }
 0x41a   :  { %6058 = vmatprep.subr.bf16.mxu0 %v6912_v5  ;;  %v8484_v5 = vmax.f32 %v8272_v34, 0.0  ;;  %v6959_v32 = vld [vmem:[%s9019_s9 + $0x480] sm:$0xff]  }
 0x41b   :  { %v2687_v34 = vpack.c.bf16 %v2639_v3, %v2639_v3  ;;  %v7005_v3 = vld [vmem:[%s9019_s9 + $0x320] sm:$0xff]  }
 0x41c   :  { %6145 = vmatpush3.bf16.msra.mxu1 %v6911_v6  ;;  %v2677_v6 = vpack.c.bf16 %v2621_v63, %v2621_v63  ;;  %v6999_v63 = vld [vmem:[%s9019_s9 + $0x590] sm:$0xff]  }
 0x41d   :  { %6059 = vmatpush3.bf16.msra.mxu0 %v6913_v7  ;;  %6146 = vmatprep.subr.bf16.mxu1 %v6914_v8  ;;  %v6958_v7 = vld [vmem:[%s9019_s9 + $0x4c0] sm:$0xff]   ;;  %v6960_v8 = vld [vmem:[%s9019_s9 + $0x248] sm:$0xff]  }
 0x41e   :  { %6060 = vmatprep.subr.bf16.mxu0 %v6916_v10  ;;  %v2682_v10 = vpack.c.bf16 %v2630_v1, %v2630_v1  ;;  %v7002_v1 = vld [vmem:[%s9019_s9 + $0x5d8] sm:$0xff]  }
 0x420   :  { %6147 = vmatpush3.bf16.msra.mxu1 %v6915_v12  ;;  %v6961_v12 = vld [vmem:[%s9019_s9 + $0x208] sm:$0xff]  }
 0x421   :  { %6061 = vmatpush3.bf16.msra.mxu0 %v6917_v13  ;;  %6148 = vmatprep.subr.bf16.mxu1 %v6918_v14  ;;  %v6962_v13 = vld [vmem:[%s9019_s9 + $0x4c8] sm:$0xff]   ;;  %v2692_v14 = vpack.c.bf16 %v8484_v5, %v8484_v5 }
 0x422   :  { %6062 = vmatprep.subr.bf16.mxu0 %v6920_v11  ;;  %v6964_v11 = vld [vmem:[%s9019_s9 + $0x250] sm:$0xff]  }
 0x424   :  { %6149 = vmatpush3.bf16.msra.mxu1 %v6919_v15  ;;  %v6963_v15 = vld [vmem:[%s9019_s9 + $0x488] sm:$0xff]  }
 0x425   :  { %6063 = vmatpush3.bf16.msra.mxu0 %v6921_v16  ;;  %6150 = vmatprep.subr.bf16.mxu1 %v6922_v17  ;;  %v6965_v16 = vld [vmem:[%s9019_s9 + $0x210] sm:$0xff]  }
 0x426   :  { %6070 = vmatprep.subr.bf16.mxu0 %v6924_v18  ;;  %v6966_v17 = vld [vmem:[%s9019_s9 + $0x4d0] sm:$0xff]   ;;  %v6968_v18 = vld [vmem:[%s9019_s9 + $0x258] sm:$0xff]  }
 0x428   :  { %6151 = vmatpush3.bf16.msra.mxu1 %v6923_v19  ;;  %4833 = vmatmul.mubr.bf16.vlgmr.msra.gmra.mrb[32].mxu0 %v2675_v22  ;;  %v6969_v19 = vld [vmem:[%s9019_s9 + $0x218] sm:$0xff]  }
 0x429   :  { %6071 = vmatpush3.bf16.msra.mxu0 %v6925_v20  ;;  %4872 = vmatprep.mubr.bf16.mxu0 %v2678_v25  ;;  %v6970_v20 = vld [vmem:[%s9019_s9 + $0x4d8] sm:$0xff]   ;;  %v6975_v25 = vld [vmem:[%s9019_s9 + $0x4a0] sm:$0xff]  }
 0x42a   :  { %6180 = vmatprep.subr.bf16.mxu1 %v6926_v23  ;;  %6072 = vmatprep.subr.bf16.mxu0 %v6928_v4  ;;  %v6971_v22 = vld [vmem:[%s9019_s9 + $0x498] sm:$0xff]   ;;  %v6973_v23 = vld [vmem:[%s9019_s9 + $0x220] sm:$0xff]   ;;  %v6976_v4 = vld [vmem:[%s9019_s9 + $0x268] sm:$0xff]  }
 0x42b   :  { %4993 = vmatmul.mubr.bf16.vlgmr.msra.gmra.mrb[32].mxu1 %v2683_v27  ;;  %v6978_v27 = vld [vmem:[%s9019_s9 + $0x4e8] sm:$0xff]  }
 0x42c   :  { %6181 = vmatpush3.bf16.msra.mxu1 %v6927_v26  ;;  %5072 = vmatprep.mubr.bf16.mxu1 %v2688_v9  ;;  %v6977_v26 = vld [vmem:[%s9019_s9 + $0x228] sm:$0xff]   ;;  %v6981_v9 = vld [vmem:[%s9019_s9 + $0x230] sm:$0xff]  }
 0x42d   :  { %6073 = vmatpush3.bf16.msra.mxu0 %v6929_v28  ;;  %6182 = vmatprep.subr.bf16.mxu1 %v6930_v50  ;;  %v6980_v28 = vld [vmem:[%s9019_s9 + $0x270] sm:$0xff]   ;;  %v6979_v50 = vld [vmem:[%s9019_s9 + $0x4a8] sm:$0xff]  }
 0x42e   :  { %6074 = vmatprep.subr.bf16.mxu0 %v6932_v29  ;;  %v6982_v29 = vld [vmem:[%s9019_s9 + $0x4f0] sm:$0xff]  }
 0x430   :  { %6183 = vmatpush3.bf16.msra.mxu1 %v6931_v30  ;;  %v6984_v30 = vld [vmem:[%s9019_s9 + $0x278] sm:$0xff]  }
 0x431   :  { %6075 = vmatpush3.bf16.msra.mxu0 %v6933_v31  ;;  %6184 = vmatprep.subr.bf16.mxu1 %v6934_v37  ;;  %v6983_v31 = vld [vmem:[%s9019_s9 + $0x4b0] sm:$0xff]   ;;  %v6985_v37 = vld [vmem:[%s9019_s9 + $0x238] sm:$0xff]  }
 0x432   :  { %6076 = vmatprep.subr.bf16.mxu0 %v6936_v39  ;;  %v6986_v39 = vld [vmem:[%s9019_s9 + $0x4f8] sm:$0xff]  }
 0x434   :  { %6185 = vmatpush3.bf16.msra.mxu1 %v6935_v40  ;;  %v2629_v40 = vrot.slane %v8258_v52, 4 }
 0x435   :  { %6077 = vmatpush3.bf16.msra.mxu0 %v6937_v43  ;;  %6186 = vmatprep.subr.bf16.mxu1 %v6938_v44  ;;  %v6988_v43 = vld [vmem:[%s9019_s9 + $0x340] sm:$0xff]   ;;  %v2638_v44 = vrot.slane %v8266_v36, 6 }
 0x436   :  { %6078 = vmatprep.subr.bf16.mxu0 %v6940_v45  ;;  %v6987_v45 = vld [vmem:[%s9019_s9 + $0x4b8] sm:$0xff]   ;;  %v6990_v36 = vld [vmem:[%s9019_s9 + $0x5c0] sm:$0xff]  }
 0x438   :  { %6187 = vmatpush3.bf16.msra.mxu1 %v6939_v46  ;;  %v8584_v46 = vmax.f32 %v8264_v35, 0.0  ;;  %v2686_v35 = vpack.c.bf16 %v2638_v44, %v2638_v44  ;;  %v7036_v44 = vld [vmem:[%s9019_s9 + $0x460] sm:$0xff]  }
 0x439   :  { %6079 = vmatpush3.bf16.msra.mxu0 %v6941_v47  ;;  %6188 = vmatprep.subr.bf16.mxu1 %v6942_v48  ;;  %v6989_v47 = vld [vmem:[%s9019_s9 + $0x300] sm:$0xff]   ;;  %v2681_v48 = vpack.c.bf16 %v2629_v40, %v2629_v40  ;;  %v7033_v40 = vld [vmem:[%s9019_s9 + $0x418] sm:$0xff]  }
 0x43a   :  { %6080 = vmatprep.subr.bf16.mxu0 %v6944_v51  ;;  %v2652_v51 = vrot.slane %v8484_v5, 2 }
 0x43c   :  { %6189 = vmatpush3.bf16.msra.mxu1 %v6943_v53  ;;  %v6992_v53 = vld [vmem:[%s9019_s9 + $0x348] sm:$0xff]  }
 0x43d   :  { %6081 = vmatpush3.bf16.msra.mxu0 %v6945_v54  ;;  %6190 = vmatprep.subr.bf16.mxu1 %v6946_v55  ;;  %v6991_v54 = vld [vmem:[%s9019_s9 + $0x580] sm:$0xff]   ;;  %v2691_v55 = vpack.c.bf16 %v8584_v46, %v8584_v46 }
 0x43e   :  { %6082 = vmatprep.subr.bf16.mxu0 %v6948_v56  ;;  %v6993_v56 = vld [vmem:[%s9019_s9 + $0x308] sm:$0xff]  }
 0x440   :  { %6191 = vmatpush3.bf16.msra.mxu1 %v6947_v57  ;;  %v6994_v57 = vld [vmem:[%s9019_s9 + $0x5c8] sm:$0xff]  }
 0x441   :  { %6083 = vmatpush3.bf16.msra.mxu0 %v6949_v58  ;;  %6192 = vmatprep.subr.bf16.mxu1 %v6950_v59  ;;  %v2696_v58 = vpack.c.bf16 %v2652_v51, %v2652_v51  ;;  %v6996_v59 = vld [vmem:[%s9019_s9 + $0x350] sm:$0xff]   ;;  %v7039_v51 = vld [vmem:[%s9019_s9 + $0x6a0] sm:$0xff]  }
 0x442   :  { %6084 = vmatprep.subr.bf16.mxu0 %v6952_v60  ;;  %v6995_v60 = vld [vmem:[%s9019_s9 + $0x588] sm:$0xff]  }
 0x444   :  { %6193 = vmatpush3.bf16.msra.mxu1 %v6951_v61  ;;  %v6997_v61 = vld [vmem:[%s9019_s9 + $0x310] sm:$0xff]  }
 0x445   :  { %6085 = vmatpush3.bf16.msra.mxu0 %v6953_v62  ;;  %6194 = vmatprep.subr.bf16.mxu1 %v6954_v41  ;;  %v6998_v62 = vld [vmem:[%s9019_s9 + $0x5d0] sm:$0xff]   ;;  %v7000_v41 = vld [vmem:[%s9019_s9 + $0x358] sm:$0xff]  }
 0x446   :  { %6114 = vmatprep.subr.bf16.mxu0 %v6956_v0  ;;  %v7001_v0 = vld [vmem:[%s9019_s9 + $0x318] sm:$0xff]  }
 0x448   :  { %6195 = vmatpush3.bf16.msra.mxu1 %v6955_v2  ;;  %4873 = vmatmul.mubr.bf16.vlgmr.msra.gmra.mrb[36].mxu0 %v2677_v6  ;;  %v7004_v2 = vld [vmem:[%s9019_s9 + $0x360] sm:$0xff]  }
 0x449   :  { %6115 = vmatpush3.bf16.msra.mxu0 %v6957_v42  ;;  %4952 = vmatprep.mubr.bf16.mxu0 %v2682_v10  ;;  %v7003_v42 = vld [vmem:[%s9019_s9 + $0x598] sm:$0xff]   ;;  %v7006_v6 = vld [vmem:[%s9019_s9 + $0x5e0] sm:$0xff]   ;;  %v7009_v10 = vld [vmem:[%s9019_s9 + $0x328] sm:$0xff]  }
 0x44a   :  { %6224 = vmatprep.subr.bf16.mxu1 %v6958_v7  ;;  %6116 = vmatprep.subr.bf16.mxu0 %v6960_v8  ;;  %v7008_v7 = vld [vmem:[%s9019_s9 + $0x368] sm:$0xff]   ;;  %v7007_v8 = vld [vmem:[%s9019_s9 + $0x5a0] sm:$0xff]  }
 0x44b   :  { %5073 = vmatmul.mubr.bf16.vlgmr.msra.gmra.mrb[36].mxu1 %v2687_v34  ;;  %v7012_v34 = vld [vmem:[%s9019_s9 + $0x370] sm:$0xff]  }
 0x44c   :  { %6225 = vmatpush3.bf16.msra.mxu1 %v6959_v32  ;;  %5152 = vmatprep.mubr.bf16.mxu1 %v2692_v14  ;;  %v7010_v32 = vld [vmem:[%s9019_s9 + $0x5e8] sm:$0xff]   ;;  %v7014_v14 = vld [vmem:[%s9019_s9 + $0x5f0] sm:$0xff]  }
 0x44d   :  { %6117 = vmatpush3.bf16.msra.mxu0 %v6961_v12  ;;  %6226 = vmatprep.subr.bf16.mxu1 %v6962_v13  ;;  %v7011_v12 = vld [vmem:[%s9019_s9 + $0x5a8] sm:$0xff]   ;;  %v7013_v13 = vld [vmem:[%s9019_s9 + $0x330] sm:$0xff]  }
 0x44e   :  { %6118 = vmatprep.subr.bf16.mxu0 %v6964_v11  ;;  %v7016_v11 = vld [vmem:[%s9019_s9 + $0x378] sm:$0xff]  }
 0x450   :  { %6227 = vmatpush3.bf16.msra.mxu1 %v6963_v15  ;;  %v7015_v15 = vld [vmem:[%s9019_s9 + $0x5b0] sm:$0xff]  }
 0x451   :  { %6119 = vmatpush3.bf16.msra.mxu0 %v6965_v16  ;;  %6228 = vmatprep.subr.bf16.mxu1 %v6966_v17  ;;  %v7017_v16 = vld [vmem:[%s9019_s9 + $0x338] sm:$0xff]  }
 0x452   :  { %6120 = vmatprep.subr.bf16.mxu0 %v6968_v18  ;;  %v7018_v17 = vld [vmem:[%s9019_s9 + $0x5f8] sm:$0xff]   ;;  %v2637_v18 = vrot.slane %v8258_v52, 6  ;;  %v2651_v52 = vrot.slane %v8584_v46, 2 }
 0x454   :  { %6229 = vmatpush3.bf16.msra.mxu1 %v6967_v49  ;;  %v7020_v49 = vld [vmem:[%s9019_s9 + $0x440] sm:$0xff]  }
 0x455   :  { %6121 = vmatpush3.bf16.msra.mxu0 %v6969_v19  ;;  %6230 = vmatprep.subr.bf16.mxu1 %v6970_v20  ;;  %v8684_v19 = vmax.f32 %v8270_v38, 0.0  ;;  %v7019_v20 = vld [vmem:[%s9019_s9 + $0x5b8] sm:$0xff]   ;;  %v7022_v38 = vld [vmem:[%s9019_s9 + $0x6c0] sm:$0xff]  }
 0x456   :  { %6122 = vmatprep.subr.bf16.mxu0 %v6972_v21  ;;  %v7021_v21 = vld [vmem:[%s9019_s9 + $0x400] sm:$0xff]  }
 0x458   :  { %6231 = vmatpush3.bf16.msra.mxu1 %v6971_v22  ;;  %v2685_v22 = vpack.c.bf16 %v2637_v18, %v2637_v18  ;;  %v7066_v18 = vld [vmem:[%s9019_s9 + $0x7d8] sm:$0xff]  }
 0x459   :  { %6123 = vmatpush3.bf16.msra.mxu0 %v6973_v23  ;;  %6232 = vmatprep.subr.bf16.mxu1 %v6974_v24  ;;  %v2660_v23 = vrot.slane %v8484_v5, 4  ;;  %v7024_v24 = vld [vmem:[%s9019_s9 + $0x448] sm:$0xff]  }
 0x45a   :  { %6124 = vmatprep.subr.bf16.mxu0 %v6976_v4  ;;  %v2690_v4 = vpack.c.bf16 %v8684_v19, %v8684_v19 }
 0x45c   :  { %6233 = vmatpush3.bf16.msra.mxu1 %v6975_v25  ;;  %v7023_v25 = vld [vmem:[%s9019_s9 + $0x680] sm:$0xff]  }
 0x45d   :  { %6125 = vmatpush3.bf16.msra.mxu0 %v6977_v26  ;;  %6234 = vmatprep.subr.bf16.mxu1 %v6978_v27  ;;  %v2695_v26 = vpack.c.bf16 %v2651_v52, %v2651_v52  ;;  %v7025_v27 = vld [vmem:[%s9019_s9 + $0x408] sm:$0xff]   ;;  %v7070_v52 = vld [vmem:[%s9019_s9 + $0x7e0] sm:$0xff]  }
 0x45e   :  { %6126 = vmatprep.subr.bf16.mxu0 %v6980_v28  ;;  %v7026_v28 = vld [vmem:[%s9019_s9 + $0x6c8] sm:$0xff]  }
 0x460   :  { %6235 = vmatpush3.bf16.msra.mxu1 %v6979_v50  ;;  %v2700_v50 = vpack.c.bf16 %v2660_v23, %v2660_v23  ;;  %v7073_v23 = vld [vmem:[%s9019_s9 + $0x528] sm:$0xff]  }
 0x461   :  { %6127 = vmatpush3.bf16.msra.mxu0 %v6981_v9  ;;  %6236 = vmatprep.subr.bf16.mxu1 %v6982_v29  ;;  %v7028_v9 = vld [vmem:[%s9019_s9 + $0x450] sm:$0xff]   ;;  %v7027_v29 = vld [vmem:[%s9019_s9 + $0x688] sm:$0xff]  }
 0x462   :  { %6128 = vmatprep.subr.bf16.mxu0 %v6984_v30  ;;  %v7029_v30 = vld [vmem:[%s9019_s9 + $0x410] sm:$0xff]  }
 0x464   :  { %6237 = vmatpush3.bf16.msra.mxu1 %v6983_v31  ;;  %v7030_v31 = vld [vmem:[%s9019_s9 + $0x6d0] sm:$0xff]  }
 0x465   :  { %6129 = vmatpush3.bf16.msra.mxu0 %v6985_v37  ;;  %6238 = vmatprep.subr.bf16.mxu1 %v6986_v39  ;;  %v7032_v37 = vld [vmem:[%s9019_s9 + $0x458] sm:$0xff]   ;;  %v7031_v39 = vld [vmem:[%s9019_s9 + $0x690] sm:$0xff]  }
 0x466   :  { %6158 = vmatprep.subr.bf16.mxu0 %v6988_v43  ;;  %v7034_v43 = vld [vmem:[%s9019_s9 + $0x6d8] sm:$0xff]  }
 0x468   :  { %6239 = vmatpush3.bf16.msra.mxu1 %v6987_v45  ;;  %4953 = vmatmul.mubr.bf16.vlgmr.msra.gmra.mrb[40].mxu0 %v2681_v48  ;;  %v7035_v45 = vld [vmem:[%s9019_s9 + $0x698] sm:$0xff]   ;;  %v7038_v48 = vld [vmem:[%s9019_s9 + $0x6e0] sm:$0xff]  }
 0x469   :  { %6159 = vmatpush3.bf16.msra.mxu0 %v6989_v47  ;;  %5032 = vmatprep.mubr.bf16.mxu0 %v2686_v35  ;;  %v7037_v47 = vld [vmem:[%s9019_s9 + $0x420] sm:$0xff]   ;;  %v7042_v35 = vld [vmem:[%s9019_s9 + $0x6e8] sm:$0xff]  }
 0x46a   :  { %6268 = vmatprep.subr.bf16.mxu1 %v6990_v36  ;;  %6160 = vmatprep.subr.bf16.mxu0 %v6992_v53  ;;  %v7040_v36 = vld [vmem:[%s9019_s9 + $0x468] sm:$0xff]  }
 0x46b   :  { %5153 = vmatmul.mubr.bf16.vlgmr.msra.gmra.mrb[40].mxu1 %v2691_v55  ;;  %v7041_v53 = vld [vmem:[%s9019_s9 + $0x428] sm:$0xff]  }
 0x46c   :  { %6269 = vmatpush3.bf16.msra.mxu1 %v6991_v54  ;;  %5232 = vmatprep.mubr.bf16.mxu1 %v2696_v58  ;;  %v7044_v54 = vld [vmem:[%s9019_s9 + $0x470] sm:$0xff]   ;;  %v7043_v55 = vld [vmem:[%s9019_s9 + $0x6a8] sm:$0xff]   ;;  %v7048_v58 = vld [vmem:[%s9019_s9 + $0x478] sm:$0xff]  }
 0x46d   :  { %6161 = vmatpush3.bf16.msra.mxu0 %v6993_v56  ;;  %6270 = vmatprep.subr.bf16.mxu1 %v6994_v57  ;;  %v7045_v56 = vld [vmem:[%s9019_s9 + $0x430] sm:$0xff]  }
 0x46e   :  { %6162 = vmatprep.subr.bf16.mxu0 %v6996_v59  ;;  %v7046_v57 = vld [vmem:[%s9019_s9 + $0x6f0] sm:$0xff]  }
 0x46f   :  { %v7047_v59 = vld [vmem:[%s9019_s9 + $0x6b0] sm:$0xff]  }
 0x470   :  { %6271 = vmatpush3.bf16.msra.mxu1 %v6995_v60  ;;  %v7049_v60 = vld [vmem:[%s9019_s9 + $0x438] sm:$0xff]  }
 0x471   :  { %6163 = vmatpush3.bf16.msra.mxu0 %v6997_v61  ;;  %6272 = vmatprep.subr.bf16.mxu1 %v6998_v62  ;;  %v7050_v61 = vld [vmem:[%s9019_s9 + $0x6f8] sm:$0xff]   ;;  %v8784_v62 = vmax.f32 %v8262_v33, 0.0  ;;  %v2659_v33 = vrot.slane %v8584_v46, 4 }
 0x472   :  { %6164 = vmatprep.subr.bf16.mxu0 %v7000_v41  ;;  %v7052_v41 = vld [vmem:[%s9019_s9 + $0x540] sm:$0xff]  }
 0x474   :  { %6273 = vmatpush3.bf16.msra.mxu1 %v6999_v63  ;;  %v2650_v63 = vrot.slane %v8684_v19, 2 }
 0x475   :  { %6165 = vmatpush3.bf16.msra.mxu0 %v7001_v0  ;;  %6274 = vmatprep.subr.bf16.mxu1 %v7002_v1  ;;  %v7051_v0 = vld [vmem:[%s9019_s9 + $0x6b8] sm:$0xff]   ;;  %v7053_v1 = vld [vmem:[%s9019_s9 + $0x500] sm:$0xff]  }
 0x476   :  { %6166 = vmatprep.subr.bf16.mxu0 %v7004_v2  ;;  %v2689_v2 = vpack.c.bf16 %v8784_v62, %v8784_v62 }
 0x478   :  { %6275 = vmatpush3.bf16.msra.mxu1 %v7003_v42  ;;  %v7054_v42 = vld [vmem:[%s9019_s9 + $0x7c0] sm:$0xff]  }
 0x479   :  { %6167 = vmatpush3.bf16.msra.mxu0 %v7005_v3  ;;  %6276 = vmatprep.subr.bf16.mxu1 %v7006_v6  ;;  %v2668_v3 = vrot.slane %v8484_v5, 6  ;;  %v7056_v6 = vld [vmem:[%s9019_s9 + $0x548] sm:$0xff]  }
 0x47a   :  { %6168 = vmatprep.subr.bf16.mxu0 %v7008_v7  ;;  %v2694_v7 = vpack.c.bf16 %v2650_v63, %v2650_v63  ;;  %v7058_v5 = vld [vmem:[%s9019_s9 + $0x7c8] sm:$0xff]   ;;  %v7097_v63 = vld [vmem:[%s9019_s9 + $0x630] sm:$0xff]  }
 0x47c   :  { %6277 = vmatpush3.bf16.msra.mxu1 %v7007_v8  ;;  %v7055_v8 = vld [vmem:[%s9019_s9 + $0x780] sm:$0xff]  }
 0x47d   :  { %6169 = vmatpush3.bf16.msra.mxu0 %v7009_v10  ;;  %6278 = vmatprep.subr.bf16.mxu1 %v7010_v32  ;;  %v2699_v10 = vpack.c.bf16 %v2659_v33, %v2659_v33  ;;  %v7057_v32 = vld [vmem:[%s9019_s9 + $0x508] sm:$0xff]   ;;  %v7098_v33 = vld [vmem:[%s9019_s9 + $0x678] sm:$0xff]  }
 0x47e   :  { %6170 = vmatprep.subr.bf16.mxu0 %v7012_v34  ;;  %v2704_v34 = vpack.c.bf16 %v2668_v3, %v2668_v3 }
 0x480   :  { %6279 = vmatpush3.bf16.msra.mxu1 %v7011_v12  ;;  %v7060_v12 = vld [vmem:[%s9019_s9 + $0x550] sm:$0xff]  }
 0x481   :  { %6171 = vmatpush3.bf16.msra.mxu0 %v7013_v13  ;;  %6280 = vmatprep.subr.bf16.mxu1 %v7014_v14  ;;  %v7059_v13 = vld [vmem:[%s9019_s9 + $0x788] sm:$0xff]   ;;  %v7061_v14 = vld [vmem:[%s9019_s9 + $0x510] sm:$0xff]  }
 0x482   :  { %6172 = vmatprep.subr.bf16.mxu0 %v7016_v11  ;;  %v7062_v11 = vld [vmem:[%s9019_s9 + $0x7d0] sm:$0xff]  }
 0x484   :  { %6281 = vmatpush3.bf16.msra.mxu1 %v7015_v15  ;;  %v7064_v15 = vld [vmem:[%s9019_s9 + $0x558] sm:$0xff]  }
 0x485   :  { %6173 = vmatpush3.bf16.msra.mxu0 %v7017_v16  ;;  %6282 = vmatprep.subr.bf16.mxu1 %v7018_v17  ;;  %v7063_v16 = vld [vmem:[%s9019_s9 + $0x790] sm:$0xff]   ;;  %v7065_v17 = vld [vmem:[%s9019_s9 + $0x518] sm:$0xff]  }
 0x486   :  { %6202 = vmatprep.subr.bf16.mxu0 %v7020_v49  ;;  %v7068_v49 = vld [vmem:[%s9019_s9 + $0x560] sm:$0xff]  }
 0x488   :  { %6283 = vmatpush3.bf16.msra.mxu1 %v7019_v20  ;;  %5033 = vmatmul.mubr.bf16.vlgmr.msra.gmra.mrb[44].mxu0 %v2685_v22  ;;  %v7067_v20 = vld [vmem:[%s9019_s9 + $0x798] sm:$0xff]   ;;  %v7072_v22 = vld [vmem:[%s9019_s9 + $0x568] sm:$0xff]  }
 0x489   :  { %6203 = vmatpush3.bf16.msra.mxu0 %v7021_v21  ;;  %5112 = vmatprep.mubr.bf16.mxu0 %v2690_v4  ;;  %v7069_v21 = vld [vmem:[%s9019_s9 + $0x520] sm:$0xff]   ;;  %v7076_v4 = vld [vmem:[%s9019_s9 + $0x570] sm:$0xff]  }
 0x48a   :  { %6312 = vmatprep.subr.bf16.mxu1 %v7022_v38  ;;  %6204 = vmatprep.subr.bf16.mxu0 %v7024_v24  ;;  %v7071_v38 = vld [vmem:[%s9019_s9 + $0x7a0] sm:$0xff]   ;;  %v7074_v24 = vld [vmem:[%s9019_s9 + $0x7e8] sm:$0xff]  }
 0x48b   :  { %5233 = vmatmul.mubr.bf16.vlgmr.msra.gmra.mrb[44].mxu1 %v2695_v26  ;;  %v7077_v26 = vld [vmem:[%s9019_s9 + $0x530] sm:$0xff]  }
 0x48c   :  { %6313 = vmatpush3.bf16.msra.mxu1 %v7023_v25  ;;  %5312 = vmatprep.mubr.bf16.mxu1 %v2700_v50  ;;  %v7075_v25 = vld [vmem:[%s9019_s9 + $0x7a8] sm:$0xff]   ;;  %v7079_v50 = vld [vmem:[%s9019_s9 + $0x7b0] sm:$0xff]  }
 0x48d   :  { %6205 = vmatpush3.bf16.msra.mxu0 %v7025_v27  ;;  %6314 = vmatprep.subr.bf16.mxu1 %v7026_v28  ;;  %v7078_v27 = vld [vmem:[%s9019_s9 + $0x7f0] sm:$0xff]   ;;  %v7080_v28 = vld [vmem:[%s9019_s9 + $0x578] sm:$0xff]  }
 0x48e   :  { %6206 = vmatprep.subr.bf16.mxu0 %v7028_v9  ;;  %v7081_v9 = vld [vmem:[%s9019_s9 + $0x538] sm:$0xff]  }
 0x490   :  { %6315 = vmatpush3.bf16.msra.mxu1 %v7027_v29  ;;  %v7082_v29 = vld [vmem:[%s9019_s9 + $0x7f8] sm:$0xff]  }
 0x491   :  { %6207 = vmatpush3.bf16.msra.mxu0 %v7029_v30  ;;  %6316 = vmatprep.subr.bf16.mxu1 %v7030_v31  ;;  %v2649_v30 = vrot.slane %v8784_v62, 2  ;;  %v7084_v31 = vld [vmem:[%s9019_s9 + $0x640] sm:$0xff]  }
 0x492   :  { %6208 = vmatprep.subr.bf16.mxu0 %v7032_v37  ;;  %v2658_v37 = vrot.slane %v8684_v19, 4 }
 0x494   :  { %6317 = vmatpush3.bf16.msra.mxu1 %v7031_v39  ;;  %v7083_v39 = vld [vmem:[%s9019_s9 + $0x7b8] sm:$0xff]  }
 0x495   :  { %6209 = vmatpush3.bf16.msra.mxu0 %v7033_v40  ;;  %6318 = vmatprep.subr.bf16.mxu1 %v7034_v43  ;;  %v7085_v40 = vld [vmem:[%s9019_s9 + $0x600] sm:$0xff]   ;;  %v2667_v43 = vrot.slane %v8584_v46, 6  ;;  %v7088_v46 = vld [vmem:[%s9019_s9 + $0x650] sm:$0xff]  }
 0x496   :  { %6210 = vmatprep.subr.bf16.mxu0 %v7036_v44  ;;  %v2693_v44 = vpack.c.bf16 %v2649_v30, %v2649_v30 }
 0x498   :  { %6319 = vmatpush3.bf16.msra.mxu1 %v7035_v45  ;;  %v7086_v45 = vld [vmem:[%s9019_s9 + $0x648] sm:$0xff]  }
 0x499   :  { %6211 = vmatpush3.bf16.msra.mxu0 %v7037_v47  ;;  %6320 = vmatprep.subr.bf16.mxu1 %v7038_v48  ;;  %v2698_v47 = vpack.c.bf16 %v2658_v37, %v2658_v37  ;;  %v2703_v48 = vpack.c.bf16 %v2667_v43, %v2667_v43  ;;  %v7115_v37 = vld [vmem:[%s9019_s9 + $0x738] sm:$0xff]  }
 0x49a   :  { %6212 = vmatprep.subr.bf16.mxu0 %v7040_v36  ;;  %v7087_v36 = vld [vmem:[%s9019_s9 + $0x608] sm:$0xff]  }
 0x49c   :  { %6321 = vmatpush3.bf16.msra.mxu1 %v7039_v51  ;;  %v7089_v51 = vld [vmem:[%s9019_s9 + $0x610] sm:$0xff]  }
 0x49d   :  { %6213 = vmatpush3.bf16.msra.mxu0 %v7041_v53  ;;  %6322 = vmatprep.subr.bf16.mxu1 %v7042_v35  ;;  %v7090_v53 = vld [vmem:[%s9019_s9 + $0x658] sm:$0xff]  }
 0x49e   :  { %6214 = vmatprep.subr.bf16.mxu0 %v7044_v54  ;;  %v7091_v35 = vld [vmem:[%s9019_s9 + $0x618] sm:$0xff]   ;;  %v7092_v54 = vld [vmem:[%s9019_s9 + $0x660] sm:$0xff]  }
 0x4a0   :  { %6323 = vmatpush3.bf16.msra.mxu1 %v7043_v55  ;;  %v7093_v55 = vld [vmem:[%s9019_s9 + $0x620] sm:$0xff]  }
 0x4a1   :  { %6215 = vmatpush3.bf16.msra.mxu0 %v7045_v56  ;;  %6324 = vmatprep.subr.bf16.mxu1 %v7046_v57  ;;  %v7094_v56 = vld [vmem:[%s9019_s9 + $0x668] sm:$0xff]  }
 0x4a2   :  { %6216 = vmatprep.subr.bf16.mxu0 %v7048_v58  ;;  %v7095_v57 = vld [vmem:[%s9019_s9 + $0x628] sm:$0xff]   ;;  %v7096_v58 = vld [vmem:[%s9019_s9 + $0x670] sm:$0xff]  }
 0x4a4   :  { %6325 = vmatpush3.bf16.msra.mxu1 %v7047_v59 }
 0x4a5   :  { %6217 = vmatpush3.bf16.msra.mxu0 %v7049_v60  ;;  %6326 = vmatprep.subr.bf16.mxu1 %v7050_v61 }
 0x4a6   :  { %6246 = vmatprep.subr.bf16.mxu0 %v7052_v41 }
 0x4a8   :  { %6327 = vmatpush3.bf16.msra.mxu1 %v7051_v0  ;;  %5113 = vmatmul.mubr.bf16.vlgmr.msra.gmra.mrb[48].mxu0 %v2689_v2 }
 0x4a9   :  { %6247 = vmatpush3.bf16.msra.mxu0 %v7053_v1  ;;  %5192 = vmatprep.mubr.bf16.mxu0 %v2694_v7  ;;  %v7099_v7 = vld [vmem:[%s9019_s9 + $0x638] sm:$0xff]  }
 0x4aa   :  { %6356 = vmatprep.subr.bf16.mxu1 %v7054_v42  ;;  %6248 = vmatprep.subr.bf16.mxu0 %v7056_v6 }
 0x4ab   :  { %5313 = vmatmul.mubr.bf16.vlgmr.msra.gmra.mrb[48].mxu1 %v2699_v10  ;;  %v7100_v10 = vld [vmem:[%s9019_s9 + $0x740] sm:$0xff]  }
 0x4ac   :  { %6357 = vmatpush3.bf16.msra.mxu1 %v7055_v8  ;;  %5392 = vmatprep.mubr.bf16.mxu1 %v2704_v34  ;;  %v2657_v8 = vrot.slane %v8784_v62, 4 }
 0x4ad   :  { %6249 = vmatpush3.bf16.msra.mxu0 %v7057_v32  ;;  %6358 = vmatprep.subr.bf16.mxu1 %v7058_v5  ;;  %v2666_v32 = vrot.slane %v8684_v19, 6  ;;  %v7101_v5 = vld [vmem:[%s9019_s9 + $0x700] sm:$0xff]   ;;  %v7104_v19 = vld [vmem:[%s9019_s9 + $0x750] sm:$0xff]  }
 0x4ae   :  { %6250 = vmatprep.subr.bf16.mxu0 %v7060_v12  ;;  %v2697_v34 = vpack.c.bf16 %v2657_v8, %v2657_v8  ;;  %v7102_v12 = vld [vmem:[%s9019_s9 + $0x748] sm:$0xff]  }
 0x4b0   :  { %6359 = vmatpush3.bf16.msra.mxu1 %v7059_v13  ;;  %v2702_v13 = vpack.c.bf16 %v2666_v32, %v2666_v32 }
 0x4b1   :  { %6251 = vmatpush3.bf16.msra.mxu0 %v7061_v14  ;;  %6360 = vmatprep.subr.bf16.mxu1 %v7062_v11  ;;  %v7103_v14 = vld [vmem:[%s9019_s9 + $0x708] sm:$0xff]   ;;  %v7105_v11 = vld [vmem:[%s9019_s9 + $0x710] sm:$0xff]  }
 0x4b2   :  { %6252 = vmatprep.subr.bf16.mxu0 %v7064_v15  ;;  %v7106_v15 = vld [vmem:[%s9019_s9 + $0x758] sm:$0xff]  }
 0x4b4   :  { %6361 = vmatpush3.bf16.msra.mxu1 %v7063_v16  ;;  %v7107_v16 = vld [vmem:[%s9019_s9 + $0x718] sm:$0xff]  }
 0x4b5   :  { %6253 = vmatpush3.bf16.msra.mxu0 %v7065_v17  ;;  %6362 = vmatprep.subr.bf16.mxu1 %v7066_v18  ;;  %v7108_v17 = vld [vmem:[%s9019_s9 + $0x760] sm:$0xff]  }
 0x4b6   :  { %6254 = vmatprep.subr.bf16.mxu0 %v7068_v49  ;;  %v7109_v18 = vld [vmem:[%s9019_s9 + $0x720] sm:$0xff]   ;;  %v7110_v49 = vld [vmem:[%s9019_s9 + $0x768] sm:$0xff]  }
 0x4b8   :  { %6363 = vmatpush3.bf16.msra.mxu1 %v7067_v20  ;;  %v7111_v20 = vld [vmem:[%s9019_s9 + $0x728] sm:$0xff]  }
 0x4b9   :  { %6255 = vmatpush3.bf16.msra.mxu0 %v7069_v21  ;;  %6364 = vmatprep.subr.bf16.mxu1 %v7070_v52  ;;  %v5701_v21 = vld [vmem:[%s9020_s10] ss:$0 sm:$0xff]  ;;  %v7112_v52 = vld [vmem:[%s9019_s9 + $0x770] sm:$0xff]  }
 0x4ba   :  { %6256 = vmatprep.subr.bf16.mxu0 %v7072_v22 }
 0x4bc   :  { %6365 = vmatpush3.bf16.msra.mxu1 %v7071_v38 }
 0x4bd   :  { %6257 = vmatpush3.bf16.msra.mxu0 %v7073_v23  ;;  %6366 = vmatprep.subr.bf16.mxu1 %v7074_v24 }
 0x4be   :  { %6258 = vmatprep.subr.bf16.mxu0 %v7076_v4 }
 0x4c0   :  { %6367 = vmatpush3.bf16.msra.mxu1 %v7075_v25  ;;  %v7113_v25 = vld [vmem:[%s9019_s9 + $0x730] sm:$0xff]  }
 0x4c1   :  { %6259 = vmatpush3.bf16.msra.mxu0 %v7077_v26  ;;  %6368 = vmatprep.subr.bf16.mxu1 %v7078_v27 }
 0x4c2   :  { %6260 = vmatprep.subr.bf16.mxu0 %v7080_v28  ;;  %v7114_v28 = vld [vmem:[%s9019_s9 + $0x778] sm:$0xff]   ;;  %s7141_s9 = smov [#allocation2]  }
 0x4c3   :  { %s5407_s29 = sshll.u32 %s7141_s9, 4  ;;  %s5408_s29 = int_to_ptr.vmem [resolvable:$true] %s5407_s29 }
 0x4c4   :  { %6369 = vmatpush3.bf16.msra.mxu1 %v7079_v50  ;;  %s7116_s5 = scalar_lea.vmem %s5408_s29, 32  ;;  %p7121_p1 = scmp.lt.s32.totalorder %s5408_s29, %s5408_s29 }
 0x4c5   :  { %6261 = vmatpush3.bf16.msra.mxu0 %v7081_v9  ;;  %6370 = vmatprep.subr.bf16.mxu1 %v7082_v29  ;;  %p7117_p0 = scmp.ne.s32.totalorder %s5408_s29, %s7116_s5  ;;  %p7122_p2 = scmp.lt.s32.totalorder %s7116_s5, %s7116_s5 }
 0x4c6   :  { %6290 = vmatprep.subr.bf16.mxu0 %v7084_v31 }
 0x4c7   :  { %p7123_p3 = por %p7122_p2, %p7121_p1 }
 0x4c8   :  { %6371 = vmatpush3.bf16.msra.mxu1 %v7083_v39  ;;  %5193 = vmatmul.mubr.bf16.vlgmr.msra.gmra.mrb[52].mxu0 %v2693_v44  ;;  %v2665_v39 = vrot.slane %v8784_v62, 6 }
 0x4c9   :  { %6291 = vmatpush3.bf16.msra.mxu0 %v7085_v40  ;;  %5272 = vmatprep.mubr.bf16.mxu0 %v2698_v47  ;;  %p7124_p4 = pnand %p7123_p3, %p7117_p0 }
 0x4ca   :  { %6292 = vmatprep.subr.bf16.mxu0 %v7086_v45  ;;  %v2701_v40 = vpack.c.bf16 %v2665_v39, %v2665_v39 }
 0x4cb   :  { %5393 = vmatmul.mubr.bf16.vlgmr.msra.gmra.mrb[52].mxu1 %v2703_v48 }
 0x4cd   :  { %6293 = vmatpush3.bf16.msra.mxu0 %v7087_v36 }
 0x4ce   :  { %6294 = vmatprep.subr.bf16.mxu0 %v7088_v46 }
 0x4d1   :  { %6295 = vmatpush3.bf16.msra.mxu0 %v7089_v51 }
 0x4d2   :  { %6296 = vmatprep.subr.bf16.mxu0 %v7090_v53 }
 0x4d5   :  { %6297 = vmatpush3.bf16.msra.mxu0 %v7091_v35 }
 0x4d6   :  { %6298 = vmatprep.subr.bf16.mxu0 %v7092_v54 }
 0x4d9   :  { %6299 = vmatpush3.bf16.msra.mxu0 %v7093_v55 }
 0x4da   :  { %6300 = vmatprep.subr.bf16.mxu0 %v7094_v56 }
 0x4db   :  { %v6042_v59 = vpop.f32.mrb[28].mxu0 }
 0x4dc   :  { %v6043_v60 = vpop.f32.mrb[29].mxu0 }
 0x4dd   :  { %v6044_v61 = vadd.f32 %v6043_v60, %v6042_v59  ;;  %6301 = vmatpush3.bf16.msra.mxu0 %v7095_v57  ;;  %v6045_v41 = vpop.f32.mrb[30].mxu0 }
 0x4de   :  { %v6108_v0 = vpop.f32.mrb[28].mxu1  ;;  %v6046_v1 = vpop.f32.mrb[31].mxu0  ;;  %6302 = vmatprep.subr.bf16.mxu0 %v7096_v58 }
 0x4df   :  { %v6109_v2 = vpop.f32.mrb[29].mxu1  ;;  %v4795_v23 = vadd.f32 %v6044_v61, %v5701_v21 }
 0x4e0   :  { %v8938_v42 = vadd.f32 %v6109_v2, %v6108_v0  ;;  %v6111_v3 = vpop.f32.mrb[30].mxu1 }
 0x4e1   :  { %v6112_v6 = vpop.f32.mrb[31].mxu1  ;;  %6303 = vmatpush3.bf16.msra.mxu0 %v7097_v63 }
 0x4e2   :  { %6304 = vmatprep.subr.bf16.mxu0 %v7098_v33 }
 0x4e5   :  { %6305 = vmatpush3.bf16.msra.mxu0 %v7099_v7 }
 0x4e6   :  { %6334 = vmatprep.subr.bf16.mxu0 %v7100_v10 }
 0x4e8   :  { %5273 = vmatmul.mubr.bf16.vlgmr.msra.gmra.mrb[56].mxu0 %v2697_v34 }
 0x4e9   :  { %6335 = vmatpush3.bf16.msra.mxu0 %v7101_v5  ;;  %5352 = vmatprep.mubr.bf16.mxu0 %v2702_v13 }
 0x4ea   :  { %6336 = vmatprep.subr.bf16.mxu0 %v7102_v12 }
 0x4ed   :  { %6337 = vmatpush3.bf16.msra.mxu0 %v7103_v14 }
 0x4ee   :  { %6338 = vmatprep.subr.bf16.mxu0 %v7104_v19 }
 0x4f1   :  { %6339 = vmatpush3.bf16.msra.mxu0 %v7105_v11 }
 0x4f2   :  { %6340 = vmatprep.subr.bf16.mxu0 %v7106_v15 }
 0x4f5   :  { %6341 = vmatpush3.bf16.msra.mxu0 %v7107_v16 }
 0x4f6   :  { %6342 = vmatprep.subr.bf16.mxu0 %v7108_v17 }
 0x4f9   :  { %6343 = vmatpush3.bf16.msra.mxu0 %v7109_v18 }
 0x4fa   :  { %6344 = vmatprep.subr.bf16.mxu0 %v7110_v49 }
 0x4fb   :  { %v6064_v22 = vpop.f32.mrb[32].mxu0 }
 0x4fc   :  { %v6065_v38 = vpop.f32.mrb[33].mxu0 }
 0x4fd   :  { %v6066_v24 = vadd.f32 %v6065_v38, %v6064_v22  ;;  %v6067_v4 = vpop.f32.mrb[34].mxu0  ;;  %6345 = vmatpush3.bf16.msra.mxu0 %v7111_v20 }
 0x4fe   :  { %v6152_v26 = vpop.f32.mrb[32].mxu1  ;;  %v6068_v27 = vpop.f32.mrb[35].mxu0  ;;  %6346 = vmatprep.subr.bf16.mxu0 %v7112_v52 }
 0x4ff   :  { %v4835_v50 = vadd.f32 %v6066_v24, %v4795_v23  ;;  %v6153_v9 = vpop.f32.mrb[33].mxu1 }
 0x500   :  { %v6154_v29 = vadd.f32 %v6153_v9, %v6152_v26  ;;  %v6155_v30 = vpop.f32.mrb[34].mxu1 }
 0x501   :  { %v6156_v31 = vpop.f32.mrb[35].mxu1  ;;  %6347 = vmatpush3.bf16.msra.mxu0 %v7113_v25 }
 0x502   :  { %6348 = vmatprep.subr.bf16.mxu0 %v7114_v28 }
 0x505   :  { %6349 = vmatpush3.bf16.msra.mxu0 %v7115_v37 }
 0x508   :  { %5353 = vmatmul.mubr.bf16.vlgmr.msra.gmra.mrb[60].mxu0 %v2701_v40 }
 0x51b   :  { %v6086_v43 = vpop.f32.mrb[36].mxu0 }
 0x51c   :  { %v6087_v44 = vpop.f32.mrb[37].mxu0 }
 0x51d   :  { %v6088_v45 = vadd.f32 %v6087_v44, %v6086_v43  ;;  %v6089_v47 = vpop.f32.mrb[38].mxu0 }
 0x51e   :  { %v6196_v48 = vpop.f32.mrb[36].mxu1  ;;  %v6090_v36 = vpop.f32.mrb[39].mxu0 }
 0x51f   :  { %v4875_v46 = vadd.f32 %v6088_v45, %v4835_v50  ;;  %v6197_v51 = vpop.f32.mrb[37].mxu1 }
 0x520   :  { %v6198_v53 = vadd.f32 %v6197_v51, %v6196_v48  ;;  %v6199_v35 = vpop.f32.mrb[38].mxu1 }
 0x521   :  { %v6200_v54 = vpop.f32.mrb[39].mxu1  ;;  %v4915_v55 = vadd.f32 %v8938_v42, %v4875_v46 }
 0x53b   :  { %v6130_v56 = vpop.f32.mrb[40].mxu0 }
 0x53c   :  { %v6131_v57 = vpop.f32.mrb[41].mxu0 }
 0x53d   :  { %v6132_v58 = vadd.f32 %v6131_v57, %v6130_v56  ;;  %v6133_v62 = vpop.f32.mrb[42].mxu0 }
 0x53e   :  { %v6240_v59 = vpop.f32.mrb[40].mxu1  ;;  %v6134_v60 = vpop.f32.mrb[43].mxu0 }
 0x53f   :  { %v4955_v61 = vadd.f32 %v6132_v58, %v4915_v55  ;;  %v6241_v41 = vpop.f32.mrb[41].mxu1 }
 0x540   :  { %v6242_v63 = vadd.f32 %v6241_v41, %v6240_v59  ;;  %v6243_v0 = vpop.f32.mrb[42].mxu1 }
 0x541   :  { %v6244_v1 = vpop.f32.mrb[43].mxu1  ;;  %v4995_v33 = vadd.f32 %v6154_v29, %v4955_v61 }
 0x55b   :  { %v6174_v2 = vpop.f32.mrb[44].mxu0 }
 0x55c   :  { %v6175_v3 = vpop.f32.mrb[45].mxu0 }
 0x55d   :  { %v6176_v6 = vadd.f32 %v6175_v3, %v6174_v2  ;;  %v6177_v7 = vpop.f32.mrb[46].mxu0 }
 0x55e   :  { %v6284_v8 = vpop.f32.mrb[44].mxu1  ;;  %v6178_v10 = vpop.f32.mrb[47].mxu0 }
 0x55f   :  { %v5035_v32 = vadd.f32 %v6176_v6, %v4995_v33  ;;  %v6285_v42 = vpop.f32.mrb[45].mxu1 }
 0x560   :  { %v6286_v5 = vadd.f32 %v6285_v42, %v6284_v8  ;;  %v6287_v34 = vpop.f32.mrb[46].mxu1 }
 0x561   :  { %v6288_v12 = vpop.f32.mrb[47].mxu1  ;;  %v5075_v13 = vadd.f32 %v6198_v53, %v5035_v32 }
 0x57b   :  { %v6218_v14 = vpop.f32.mrb[48].mxu0 }
 0x57c   :  { %v6219_v19 = vpop.f32.mrb[49].mxu0 }
 0x57d   :  { %v6220_v11 = vadd.f32 %v6219_v19, %v6218_v14  ;;  %v6221_v15 = vpop.f32.mrb[50].mxu0 }
 0x57e   :  { %v6328_v16 = vpop.f32.mrb[48].mxu1  ;;  %v6222_v17 = vpop.f32.mrb[51].mxu0 }
 0x57f   :  { %v5115_v18 = vadd.f32 %v6220_v11, %v5075_v13  ;;  %v6329_v49 = vpop.f32.mrb[49].mxu1 }
 0x580   :  { %v6330_v20 = vadd.f32 %v6329_v49, %v6328_v16  ;;  %v6331_v21 = vpop.f32.mrb[50].mxu1 }
 0x581   :  { %v6332_v52 = vpop.f32.mrb[51].mxu1  ;;  %v5155_v22 = vadd.f32 %v6242_v63, %v5115_v18 }
 0x59b   :  { %v6262_v38 = vpop.f32.mrb[52].mxu0 }
 0x59c   :  { %v6263_v23 = vpop.f32.mrb[53].mxu0 }
 0x59d   :  { %v6264_v24 = vadd.f32 %v6263_v23, %v6262_v38  ;;  %v6265_v4 = vpop.f32.mrb[54].mxu0 }
 0x59e   :  { %v6372_v25 = vpop.f32.mrb[52].mxu1  ;;  %v6266_v26 = vpop.f32.mrb[55].mxu0 }
 0x59f   :  { %v5195_v27 = vadd.f32 %v6264_v24, %v5155_v22  ;;  %v6373_v28 = vpop.f32.mrb[53].mxu1 }
 0x5a0   :  { %v6374_v50 = vadd.f32 %v6373_v28, %v6372_v25  ;;  %v6375_v9 = vpop.f32.mrb[54].mxu1 }
 0x5a1   :  { %v6376_v29 = vpop.f32.mrb[55].mxu1  ;;  %v5235_v30 = vadd.f32 %v6286_v5, %v5195_v27 }
 0x5bb   :  { %v6306_v31 = vpop.f32.mrb[56].mxu0 }
 0x5bc   :  { %v6307_v37 = vpop.f32.mrb[57].mxu0 }
 0x5bd   :  { %v6308_v39 = vadd.f32 %v6307_v37, %v6306_v31  ;;  %v6309_v40 = vpop.f32.mrb[58].mxu0 }
 0x5be   :  { %v6310_v43 = vpop.f32.mrb[59].mxu0 }
 0x5bf   :  { %v5275_v44 = vadd.f32 %v6308_v39, %v5235_v30 }
 0x5c1   :  { %v5315_v45 = vadd.f32 %v6330_v20, %v5275_v44 }
 0x5db   :  { %v6350_v47 = vpop.f32.mrb[60].mxu0 }
 0x5dc   :  { %v6351_v48 = vpop.f32.mrb[61].mxu0 }
 0x5dd   :  { %v6352_v36 = vadd.f32 %v6351_v48, %v6350_v47  ;;  %v6353_v46 = vpop.f32.mrb[62].mxu0 }
 0x5de   :  { %v6354_v51 = vpop.f32.mrb[63].mxu0 }
 0x5df   :  { %v5355_v53 = vadd.f32 %v6352_v36, %v5315_v45 }
 0x5e1   :  { %v5395_v35 = vadd.f32 %v6374_v50, %v5355_v53 }
 0x5e3   :  { %5400 = vst [vmem:[#allocation2] sm:$0x3] %v5395_v35 }
 0x5e4   :  { %7127 = shalt.err (!%p7124_p4)
}
 0x5e5   :  { %s7128_s12 = scalar_lea.hbm %s9021_s11, 32 }
 0x5e6   :  { %p7129_p5 = scmp.ne.s32.totalorder %s9021_s11, %s7128_s12  ;;  %p7132_p6 = scmp.lt.u32.totalorder %s7128_s12, %s9021_s11 }
 0x5e8   :  { %p7134_p7 = pnand %p7132_p6, %p7129_p5 }
 0x5ea   :  { %7137 = shalt.err (!%p7134_p7)
}
 0x5eb   :  { %5410 = dma.vmem_to_hbm [thread:$0]  %s5408_s29, 32, %s9021_s11, [#allocation3]  }
 0x5ec   :  { %7138 = dma.done.wait [#allocation3], 32  }
 0x5ed   :  { %7139 = vsyncadd [#allocation3], 4294967264 }
 0x5ee   :  { %5414 = vsyncpa [#allocation3], 1 }

</bundles_post_ra>
